<compile_context>
chip_gen: v7x
topology: tpu7x:2x2x1
jax: 0.10.0
libtpu: 0.0.40
codegen_flags: <defaults>
</compile_context>

<pallas_src>
import functools

import jax
import jax.numpy as jnp
from jax.experimental import pallas as pl
from jax.experimental.pallas import tpu as pltpu

HIDDEN_SIZE = 32          # global HIDDEN_SIZE referenced by the PyTorch module
NUM_HEADS = 4
MLP_DIM = 4 * HIDDEN_SIZE
PATCH = 4
IN_CH = 3
LN_EPS = 1e-5             # PyTorch nn.LayerNorm default


# ----------------------------------------------------------------------------
# In-kernel helpers
# ----------------------------------------------------------------------------
def _ln(x, g, b):
    """LayerNorm over the last axis; x (M,H) f32, g/b (1,H)."""
    mu = jnp.mean(x, axis=-1, keepdims=True)
    var = jnp.mean(jnp.square(x - mu), axis=-1, keepdims=True)
    return (x - mu) * jax.lax.rsqrt(var + LN_EPS) * g + b


def _bf16(v):
    return v.astype(jnp.bfloat16)


# ----------------------------------------------------------------------------
# The single fused kernel: patch-embed -> blocks -> decoder head (per batch elem)
# ----------------------------------------------------------------------------
def _fused_kernel(patches_ref, pw_ref, pb_ref, pos_ref, vecs_ref,
                  qkvw_ref, qkvb_ref, projw_ref, fc1w_ref, fc1b_ref, fc2w_ref,
                  *head_refs, num_blocks, num_heads):
    o_ref = head_refs[-1]
    head_wb = head_refs[:-1]
    num_deconv = len(head_wb) // 2 - 1

    # --- patch-embed matmul fused with bias + positional embedding ---
    x = jnp.dot(_bf16(patches_ref[...]), pw_ref[...],
                preferred_element_type=jnp.float32)
    x = x + pb_ref[...] + pos_ref[...]                       # (N, H) f32
    n_tok, hidden = x.shape
    head_dim = hidden // num_heads
    scale = 1.0 / (float(head_dim) ** 0.5)

    # --- transformer blocks (static unroll, VMEM resident) ---
    for l in range(num_blocks):
        vecs = vecs_ref[l]            # (6, H): ln1_g, ln1_b, ln2_g, ln2_b, proj_b, fc2_b

        # MHSA
        h = _ln(x, vecs[0:1], vecs[1:2])
        qkv = jnp.dot(_bf16(h), qkvw_ref[l],
                      preferred_element_type=jnp.float32) + qkvb_ref[l]   # (N, 3H)
        attn = None
        for hd in range(num_heads):                           # static head loop
            base = 3 * head_dim * hd                          # head-contiguous [q|k|v]
            q = qkv[:, base:base + head_dim]
            k = qkv[:, base + head_dim:base + 2 * head_dim]
            v = qkv[:, base + 2 * head_dim:base + 3 * head_dim]
            s = jax.lax.dot_general(_bf16(q), _bf16(k), (((1,), (1,)), ((), ())),
                                    preferred_element_type=jnp.float32) * scale
            s = s - jnp.max(s, axis=-1, keepdims=True)
            p = jnp.exp(s)
            p = p / jnp.sum(p, axis=-1, keepdims=True)        # exact softmax denom
            pv = jnp.dot(_bf16(p), _bf16(v), preferred_element_type=jnp.float32)
            # fold the head-concat into the output projection (per-head accumulation)
            contrib = jnp.dot(_bf16(pv), projw_ref[l, hd],
                              preferred_element_type=jnp.float32)         # (N, H)
            attn = contrib if attn is None else attn + contrib
        x = x + attn + vecs[4:5]

        # MLP
        h = _ln(x, vecs[2:3], vecs[3:4])
        h = jnp.dot(_bf16(h), fc1w_ref[l],
                    preferred_element_type=jnp.float32) + fc1b_ref[l]
        h = jax.nn.gelu(h)            # TODO(synk): tanh approx (see header note)
        h = jnp.dot(_bf16(h), fc2w_ref[l],
                    preferred_element_type=jnp.float32) + vecs[5:6]
        x = x + h

    # --- decoder head: k=2,s=2 deconvs as per-pixel matmuls (no kron, no reshape) ---
    # A k=s=2 ConvTranspose2d writes each output sub-pixel (a,b) from exactly one input
    # pixel, so layer d is: y <- relu(y @ W_d + b_d) with columns ordered (a, b, c_out),
    # followed by moving the 4 sub-pixels from lanes to rows (slice + row-concat).
    y = x                                                      # (N, HIDDEN) f32
    for d in range(num_deconv):
        w = head_wb[2 * d][...]                                # (C_in, 4*C_out) bf16
        b = head_wb[2 * d + 1][...]                            # (1, 4*C_out)   f32
        c_out = w.shape[1] // 4
        y = jnp.dot(_bf16(y), w, preferred_element_type=jnp.float32) + b
        y = jnp.maximum(y, 0.0)
        y = jnp.concatenate([y[:, s * c_out:(s + 1) * c_out] for s in range(4)], axis=0)
    wf = head_wb[2 * num_deconv][...]                          # final 1x1 conv (C, K)
    bf = head_wb[2 * num_deconv + 1][...]
    out = jnp.dot(_bf16(y), wf, preferred_element_type=jnp.float32) + bf
    o_ref[...] = out.astype(o_ref.dtype)                       # rows: (s_{L-1},..,s_0,n)


# ----------------------------------------------------------------------------
# Parameters (deterministic, synthetic).  Matmul weights stored bf16, rest f32.
# ----------------------------------------------------------------------------
def init_params(key, num_blocks, num_keypoints, num_deconv_layers,
                num_deconv_filters, num_deconv_kernels, num_patches):
    keys = iter(jax.random.split(key, 16 + num_deconv_layers))

    def nrm(shape, scale=0.02, dtype=jnp.bfloat16):
        return (scale * jax.random.normal(next(keys), shape)).astype(dtype)

    nb, H, MLP, dh = num_blocks, HIDDEN_SIZE, MLP_DIM, HIDDEN_SIZE // NUM_HEADS

    # width-H per-block vectors packed into one operand:
    # rows = [ln1_g, ln1_b, ln2_g, ln2_b, proj_b, fc2_b]
    vecs = jnp.stack([jnp.ones((H,)), jnp.zeros((H,)), jnp.ones((H,)),
                      jnp.zeros((H,)), jnp.zeros((H,)), jnp.zeros((H,))]
                     ).astype(jnp.float32)

    params = {
        "patch_w": nrm((IN_CH * PATCH * PATCH, H)),            # Conv2d(3,H,k=P,s=P) as matmul
        "patch_b": jnp.zeros((1, H), jnp.float32),
        "pos_emb": nrm((num_patches, H), dtype=jnp.float32),
        "vecs": jnp.tile(vecs[None], (nb, 1, 1)),              # (nb, 6, H) f32
        "qkv_w": nrm((nb, H, 3 * H)),                          # head-contiguous [q_h|k_h|v_h]
        "qkv_b": jnp.zeros((nb, 1, 3 * H), jnp.float32),
        "proj_w": nrm((nb, NUM_HEADS, dh, H)),                 # per-head proj slabs
        "fc1_w": nrm((nb, H, MLP)),
        "fc1_b": jnp.zeros((nb, 1, MLP), jnp.float32),
        "fc2_w": nrm((nb, MLP, H)),
        "head_w": [],
        "head_b": [],
    }

    # Decoder head: ConvTranspose2d(C_in, C_out, k=2, s=2) flattened to (C_in, 4*C_out)
    # with column order (a, b, c_out); final 1x1 Conv2d as a plain (C, K) matmul.
    c_in = H
    for l in range(num_deconv_layers):
        c_out, k = num_deconv_filters[l], num_deconv_kernels[l]
        assert k == 2, "ConvTranspose2d with kernel=stride=2 assumed"
        params["head_w"].append(nrm((c_in, k * k * c_out)))
        params["head_b"].append(jnp.zeros((1, k * k * c_out), jnp.float32))
        c_in = c_out
    params["head_w"].append(nrm((c_in, num_keypoints)))
    params["head_b"].append(jnp.zeros((1, num_keypoints), jnp.float32))
    return params


# ----------------------------------------------------------------------------
# Forward pass: im2col + ONE pallas_call + final NCHW rearrangement
# ----------------------------------------------------------------------------
def transformer_pose_forward(params, x_nchw, mode="test"):
    del mode  # eval-mode behaviour only (see TODO at top)
    B, C, Himg, Wimg = x_nchw.shape
    Hp, Wp = Himg // PATCH, Wimg // PATCH
    N = Hp * Wp
    kdim = C * PATCH * PATCH

    # im2col for the stride=patch conv (token order (i, j), column order (c, ph, pw))
    patches = x_nchw.reshape(B, C, Hp, PATCH, Wp, PATCH)
    patches = patches.transpose(0, 2, 4, 1, 3, 5).reshape(B * N, kdim)

    num_blocks = params["qkv_w"].shape[0]
    head_w, head_b = params["head_w"], params["head_b"]
    L = len(head_w) - 1                                        # num deconv layers
    K = head_w[-1].shape[1]                                    # num keypoints
    rows = N * (4 ** L)                                        # per-batch output rows

    ops = [patches, params["patch_w"], params["patch_b"], params["pos_emb"],
           params["vecs"], params["qkv_w"], params["qkv_b"], params["proj_w"],
           params["fc1_w"], params["fc1_b"], params["fc2_w"]]
    for w, b in zip(head_w, head_b):
        ops += [w, b]

    def const_spec(a):
        return pl.BlockSpec(a.shape, lambda i, _n=a.ndim: (0,) * _n)

    in_specs = ([pl.BlockSpec((N, kdim), lambda i: (i, 0))]
                + [const_spec(a) for a in ops[1:]])
    out_specs = pl.BlockSpec((rows, K), lambda i: (i, 0))

    y = pl.pallas_call(
        functools.partial(_fused_kernel, num_blocks=num_blocks, num_heads=NUM_HEADS),
        out_shape=jax.ShapeDtypeStruct((B * rows, K), jnp.float32),
        grid=(B,),
        in_specs=in_specs,
        out_specs=out_specs,
        compiler_params=pltpu.CompilerParams(dimension_semantics=("parallel",)),
    )(*ops)

    # Kernel row order per batch element is (s_{L-1}, ..., s_0, i, j) with s = 2a + b.
    # One XLA-side reshape/transpose produces NCHW heatmaps.
    y = y.reshape((B,) + (2, 2) * L + (Hp, Wp, K))
    perm = ([0, 2 * L + 3, 2 * L + 1] + [2 * L - 1 - 2 * t for t in range(L)]
            + [2 * L + 2] + [2 * L - 2 * t for t in range(L)])
    up = 2 ** L
    return jnp.transpose(y, perm).reshape(B, K, Hp * up, Wp * up)


if __name__ == "__main__":
    key = jax.random.PRNGKey(0)
    pkey, xkey = jax.random.split(key)

    B, C, Himg, Wimg = 2, IN_CH, 16, 16
    num_blocks = 2
    num_keypoints = 14
    num_deconv_layers = 2
    num_deconv_filters = (32, 32)       # scaled-down from the default (224, 224)
    num_deconv_kernels = (2, 2)
    num_patches = (Himg // PATCH) * (Wimg // PATCH)

    params = init_params(pkey, num_blocks, num_keypoints, num_deconv_layers,
                         num_deconv_filters, num_deconv_kernels, num_patches)
    x = jax.random.normal(xkey, (B, C, Himg, Wimg), dtype=jnp.float32)

    fwd = jax.jit(functools.partial(transformer_pose_forward, mode="test"))
    out = fwd(params, x)
    jax.block_until_ready(out)
    assert out.shape == (B, num_keypoints, Himg, Wimg), out.shape
    assert out.dtype == jnp.float32
    assert bool(jnp.all(jnp.isfinite(out)))
    print("KERNEL_OK")
</pallas_src>

<mosaic_0001>
module attributes {stable_mosaic.version = 11 : i64} {
  func.func @_fused_kernel(%arg0: i32, %arg1: memref<16x48xf32, #tpu.memory_space<vmem>>, %arg2: memref<48x32xbf16, #tpu.memory_space<vmem>>, %arg3: memref<1x32xf32, #tpu.memory_space<vmem>>, %arg4: memref<16x32xf32, #tpu.memory_space<vmem>>, %arg5: memref<2x6x32xf32, #tpu.memory_space<vmem>>, %arg6: memref<2x32x96xbf16, #tpu.memory_space<vmem>>, %arg7: memref<2x1x96xf32, #tpu.memory_space<vmem>>, %arg8: memref<2x4x8x32xbf16, #tpu.memory_space<vmem>>, %arg9: memref<2x32x128xbf16, #tpu.memory_space<vmem>>, %arg10: memref<2x1x128xf32, #tpu.memory_space<vmem>>, %arg11: memref<2x128x32xbf16, #tpu.memory_space<vmem>>, %arg12: memref<32x128xbf16, #tpu.memory_space<vmem>>, %arg13: memref<1x128xf32, #tpu.memory_space<vmem>>, %arg14: memref<32x128xbf16, #tpu.memory_space<vmem>>, %arg15: memref<1x128xf32, #tpu.memory_space<vmem>>, %arg16: memref<32x14xbf16, #tpu.memory_space<vmem>>, %arg17: memref<1x14xf32, #tpu.memory_space<vmem>>, %arg18: memref<256x14xf32, #tpu.memory_space<vmem>>) attributes {dimension_semantics = [#tpu.dimension_semantics<parallel>], iteration_bounds = array<i64: 2>, scalar_prefetch = 0 : i64, scratch_operands = 0 : i64, tpu.core_type = #tpu.core_type<tc>, window_params = [{transform_indices = @transform_0, window_bounds = array<i64: 16, 48>}, {pipeline_mode = #tpu.pipeline_mode<synchronous>, transform_indices = @transform_1, window_bounds = array<i64: 48, 32>}, {pipeline_mode = #tpu.pipeline_mode<synchronous>, transform_indices = @transform_2, window_bounds = array<i64: 1, 32>}, {pipeline_mode = #tpu.pipeline_mode<synchronous>, transform_indices = @transform_3, window_bounds = array<i64: 16, 32>}, {pipeline_mode = #tpu.pipeline_mode<synchronous>, transform_indices = @transform_4, window_bounds = array<i64: 2, 6, 32>}, {pipeline_mode = #tpu.pipeline_mode<synchronous>, transform_indices = @transform_5, window_bounds = array<i64: 2, 32, 96>}, {pipeline_mode = #tpu.pipeline_mode<synchronous>, transform_indices = @transform_6, window_bounds = array<i64: 2, 1, 96>}, {pipeline_mode = #tpu.pipeline_mode<synchronous>, transform_indices = @transform_7, window_bounds = array<i64: 2, 4, 8, 32>}, {pipeline_mode = #tpu.pipeline_mode<synchronous>, transform_indices = @transform_8, window_bounds = array<i64: 2, 32, 128>}, {pipeline_mode = #tpu.pipeline_mode<synchronous>, transform_indices = @transform_9, window_bounds = array<i64: 2, 1, 128>}, {pipeline_mode = #tpu.pipeline_mode<synchronous>, transform_indices = @transform_10, window_bounds = array<i64: 2, 128, 32>}, {pipeline_mode = #tpu.pipeline_mode<synchronous>, transform_indices = @transform_11, window_bounds = array<i64: 32, 128>}, {pipeline_mode = #tpu.pipeline_mode<synchronous>, transform_indices = @transform_12, window_bounds = array<i64: 1, 128>}, {pipeline_mode = #tpu.pipeline_mode<synchronous>, transform_indices = @transform_13, window_bounds = array<i64: 32, 128>}, {pipeline_mode = #tpu.pipeline_mode<synchronous>, transform_indices = @transform_14, window_bounds = array<i64: 1, 128>}, {pipeline_mode = #tpu.pipeline_mode<synchronous>, transform_indices = @transform_15, window_bounds = array<i64: 32, 14>}, {pipeline_mode = #tpu.pipeline_mode<synchronous>, transform_indices = @transform_16, window_bounds = array<i64: 1, 14>}, {transform_indices = @transform_17, window_bounds = array<i64: 256, 14>}]} {
    %c0 = arith.constant 0 : index
    %c0_0 = arith.constant 0 : index
    %0 = vector.load %arg1[%c0, %c0_0] : memref<16x48xf32, #tpu.memory_space<vmem>>, vector<16x48xf32>
    %1 = arith.truncf %0 : vector<16x48xf32> to vector<16x48xbf16>
    %c0_1 = arith.constant 0 : index
    %c0_2 = arith.constant 0 : index
    %2 = vector.load %arg2[%c0_1, %c0_2] : memref<48x32xbf16, #tpu.memory_space<vmem>>, vector<48x32xbf16>
    %cst = arith.constant dense<0.000000e+00> : vector<16x32xf32>
    %3 = tpu.matmul %1, %2, %cst {dimension_numbers = #tpu.dot_dimension_numbers<[1], [0], [0], [1], [0, 0, 1, 1], [], []>} : vector<16x48xbf16>, vector<48x32xbf16>, vector<16x32xf32> -> vector<16x32xf32>
    %c0_3 = arith.constant 0 : index
    %c0_4 = arith.constant 0 : index
    %4 = vector.load %arg3[%c0_3, %c0_4] : memref<1x32xf32, #tpu.memory_space<vmem>>, vector<1x32xf32>
    %5 = vector.broadcast %4 : vector<1x32xf32> to vector<16x32xf32>
    %6 = arith.addf %3, %5 : vector<16x32xf32>
    %c0_5 = arith.constant 0 : index
    %c0_6 = arith.constant 0 : index
    %7 = vector.load %arg4[%c0_5, %c0_6] : memref<16x32xf32, #tpu.memory_space<vmem>>, vector<16x32xf32>
    %8 = arith.addf %6, %7 : vector<16x32xf32>
    %c0_7 = arith.constant 0 : index
    %c0_8 = arith.constant 0 : index
    %c0_9 = arith.constant 0 : index
    %9 = vector.load %arg5[%c0_7, %c0_8, %c0_9] : memref<2x6x32xf32, #tpu.memory_space<vmem>>, vector<1x6x32xf32>
    %10 = vector.shape_cast %9 : vector<1x6x32xf32> to vector<6x32xf32>
    %11 = vector.extract_strided_slice %10 {offsets = [0, 0], sizes = [1, 32], strides = [1, 1]} : vector<6x32xf32> to vector<1x32xf32>
    %12 = vector.extract_strided_slice %10 {offsets = [1, 0], sizes = [1, 32], strides = [1, 1]} : vector<6x32xf32> to vector<1x32xf32>
    %cst_10 = arith.constant dense<0.000000e+00> : vector<16xf32>
    %13 = vector.multi_reduction <add>, %8, %cst_10 [1] : vector<16x32xf32> to vector<16xf32>
    %14 = vector.shape_cast %13 : vector<16xf32> to vector<16x1xf32>
    %cst_11 = arith.constant 3.200000e+01 : f32
    %15 = vector.broadcast %cst_11 : f32 to vector<16x1xf32>
    %16 = arith.divf %14, %15 : vector<16x1xf32>
    %17 = vector.broadcast %16 : vector<16x1xf32> to vector<16x32xf32>
    %18 = arith.subf %8, %17 : vector<16x32xf32>
    %19 = arith.mulf %18, %18 : vector<16x32xf32>
    %cst_12 = arith.constant dense<0.000000e+00> : vector<16xf32>
    %20 = vector.multi_reduction <add>, %19, %cst_12 [1] : vector<16x32xf32> to vector<16xf32>
    %21 = vector.shape_cast %20 : vector<16xf32> to vector<16x1xf32>
    %cst_13 = arith.constant 3.200000e+01 : f32
    %22 = vector.broadcast %cst_13 : f32 to vector<16x1xf32>
    %23 = arith.divf %21, %22 : vector<16x1xf32>
    %24 = vector.broadcast %16 : vector<16x1xf32> to vector<16x32xf32>
    %25 = arith.subf %8, %24 : vector<16x32xf32>
    %cst_14 = arith.constant 9.99999974E-6 : f32
    %26 = vector.broadcast %cst_14 : f32 to vector<16x1xf32>
    %27 = arith.addf %23, %26 : vector<16x1xf32>
    %28 = math.rsqrt %27 : vector<16x1xf32>
    %29 = vector.broadcast %28 : vector<16x1xf32> to vector<16x32xf32>
    %30 = arith.mulf %25, %29 : vector<16x32xf32>
    %31 = vector.broadcast %11 : vector<1x32xf32> to vector<16x32xf32>
    %32 = arith.mulf %30, %31 : vector<16x32xf32>
    %33 = vector.broadcast %12 : vector<1x32xf32> to vector<16x32xf32>
    %34 = arith.addf %32, %33 : vector<16x32xf32>
    %35 = arith.truncf %34 : vector<16x32xf32> to vector<16x32xbf16>
    %c0_15 = arith.constant 0 : index
    %c0_16 = arith.constant 0 : index
    %c0_17 = arith.constant 0 : index
    %36 = vector.load %arg6[%c0_15, %c0_16, %c0_17] : memref<2x32x96xbf16, #tpu.memory_space<vmem>>, vector<1x32x96xbf16>
    %37 = vector.shape_cast %36 : vector<1x32x96xbf16> to vector<32x96xbf16>
    %cst_18 = arith.constant dense<0.000000e+00> : vector<16x96xf32>
    %38 = tpu.matmul %35, %37, %cst_18 {dimension_numbers = #tpu.dot_dimension_numbers<[1], [0], [0], [1], [0, 0, 1, 1], [], []>} : vector<16x32xbf16>, vector<32x96xbf16>, vector<16x96xf32> -> vector<16x96xf32>
    %c0_19 = arith.constant 0 : index
    %c0_20 = arith.constant 0 : index
    %c0_21 = arith.constant 0 : index
    %39 = vector.load %arg7[%c0_19, %c0_20, %c0_21] : memref<2x1x96xf32, #tpu.memory_space<vmem>>, vector<1x1x96xf32>
    %40 = vector.shape_cast %39 : vector<1x1x96xf32> to vector<1x96xf32>
    %41 = vector.broadcast %40 : vector<1x96xf32> to vector<16x96xf32>
    %42 = arith.addf %38, %41 : vector<16x96xf32>
    %43 = vector.extract_strided_slice %42 {offsets = [0, 0], sizes = [16, 8], strides = [1, 1]} : vector<16x96xf32> to vector<16x8xf32>
    %44 = vector.extract_strided_slice %42 {offsets = [0, 8], sizes = [16, 8], strides = [1, 1]} : vector<16x96xf32> to vector<16x8xf32>
    %45 = vector.extract_strided_slice %42 {offsets = [0, 16], sizes = [16, 8], strides = [1, 1]} : vector<16x96xf32> to vector<16x8xf32>
    %46 = arith.truncf %43 : vector<16x8xf32> to vector<16x8xbf16>
    %47 = arith.truncf %44 : vector<16x8xf32> to vector<16x8xbf16>
    %cst_22 = arith.constant dense<0.000000e+00> : vector<16x16xf32>
    %48 = tpu.matmul %46, %47, %cst_22 {dimension_numbers = #tpu.dot_dimension_numbers<[1], [1], [0], [0], [0, 0, 1, 0], [], []>} : vector<16x8xbf16>, vector<16x8xbf16>, vector<16x16xf32> -> vector<16x16xf32>
    %cst_23 = arith.constant 0.353553385 : f32
    %49 = vector.broadcast %cst_23 : f32 to vector<16x16xf32>
    %50 = arith.mulf %48, %49 : vector<16x16xf32>
    %cst_24 = arith.constant dense<0xFF800000> : vector<16xf32>
    %51 = vector.multi_reduction <maximumf>, %50, %cst_24 [1] : vector<16x16xf32> to vector<16xf32>
    %52 = vector.shape_cast %51 : vector<16xf32> to vector<16x1xf32>
    %53 = vector.broadcast %52 : vector<16x1xf32> to vector<16x16xf32>
    %54 = arith.subf %50, %53 : vector<16x16xf32>
    %55 = math.exp %54 : vector<16x16xf32>
    %cst_25 = arith.constant dense<0.000000e+00> : vector<16xf32>
    %56 = vector.multi_reduction <add>, %55, %cst_25 [1] : vector<16x16xf32> to vector<16xf32>
    %57 = vector.shape_cast %56 : vector<16xf32> to vector<16x1xf32>
    %58 = vector.broadcast %57 : vector<16x1xf32> to vector<16x16xf32>
    %59 = arith.divf %55, %58 : vector<16x16xf32>
    %60 = arith.truncf %59 : vector<16x16xf32> to vector<16x16xbf16>
    %61 = arith.truncf %45 : vector<16x8xf32> to vector<16x8xbf16>
    %cst_26 = arith.constant dense<0.000000e+00> : vector<16x8xf32>
    %62 = tpu.matmul %60, %61, %cst_26 {dimension_numbers = #tpu.dot_dimension_numbers<[1], [0], [0], [1], [0, 0, 1, 1], [], []>} : vector<16x16xbf16>, vector<16x8xbf16>, vector<16x8xf32> -> vector<16x8xf32>
    %63 = arith.truncf %62 : vector<16x8xf32> to vector<16x8xbf16>
    %c0_27 = arith.constant 0 : index
    %c0_28 = arith.constant 0 : index
    %c0_29 = arith.constant 0 : index
    %c0_30 = arith.constant 0 : index
    %64 = vector.load %arg8[%c0_27, %c0_28, %c0_29, %c0_30] : memref<2x4x8x32xbf16, #tpu.memory_space<vmem>>, vector<1x1x8x32xbf16>
    %65 = vector.shape_cast %64 : vector<1x1x8x32xbf16> to vector<8x32xbf16>
    %cst_31 = arith.constant dense<0.000000e+00> : vector<16x32xf32>
    %66 = tpu.matmul %63, %65, %cst_31 {dimension_numbers = #tpu.dot_dimension_numbers<[1], [0], [0], [1], [0, 0, 1, 1], [], []>} : vector<16x8xbf16>, vector<8x32xbf16>, vector<16x32xf32> -> vector<16x32xf32>
    %67 = vector.extract_strided_slice %42 {offsets = [0, 24], sizes = [16, 8], strides = [1, 1]} : vector<16x96xf32> to vector<16x8xf32>
    %68 = vector.extract_strided_slice %42 {offsets = [0, 32], sizes = [16, 8], strides = [1, 1]} : vector<16x96xf32> to vector<16x8xf32>
    %69 = vector.extract_strided_slice %42 {offsets = [0, 40], sizes = [16, 8], strides = [1, 1]} : vector<16x96xf32> to vector<16x8xf32>
    %70 = arith.truncf %67 : vector<16x8xf32> to vector<16x8xbf16>
    %71 = arith.truncf %68 : vector<16x8xf32> to vector<16x8xbf16>
    %cst_32 = arith.constant dense<0.000000e+00> : vector<16x16xf32>
    %72 = tpu.matmul %70, %71, %cst_32 {dimension_numbers = #tpu.dot_dimension_numbers<[1], [1], [0], [0], [0, 0, 1, 0], [], []>} : vector<16x8xbf16>, vector<16x8xbf16>, vector<16x16xf32> -> vector<16x16xf32>
    %cst_33 = arith.constant 0.353553385 : f32
    %73 = vector.broadcast %cst_33 : f32 to vector<16x16xf32>
    %74 = arith.mulf %72, %73 : vector<16x16xf32>
    %cst_34 = arith.constant dense<0xFF800000> : vector<16xf32>
    %75 = vector.multi_reduction <maximumf>, %74, %cst_34 [1] : vector<16x16xf32> to vector<16xf32>
    %76 = vector.shape_cast %75 : vector<16xf32> to vector<16x1xf32>
    %77 = vector.broadcast %76 : vector<16x1xf32> to vector<16x16xf32>
    %78 = arith.subf %74, %77 : vector<16x16xf32>
    %79 = math.exp %78 : vector<16x16xf32>
    %cst_35 = arith.constant dense<0.000000e+00> : vector<16xf32>
    %80 = vector.multi_reduction <add>, %79, %cst_35 [1] : vector<16x16xf32> to vector<16xf32>
    %81 = vector.shape_cast %80 : vector<16xf32> to vector<16x1xf32>
    %82 = vector.broadcast %81 : vector<16x1xf32> to vector<16x16xf32>
    %83 = arith.divf %79, %82 : vector<16x16xf32>
    %84 = arith.truncf %83 : vector<16x16xf32> to vector<16x16xbf16>
    %85 = arith.truncf %69 : vector<16x8xf32> to vector<16x8xbf16>
    %cst_36 = arith.constant dense<0.000000e+00> : vector<16x8xf32>
    %86 = tpu.matmul %84, %85, %cst_36 {dimension_numbers = #tpu.dot_dimension_numbers<[1], [0], [0], [1], [0, 0, 1, 1], [], []>} : vector<16x16xbf16>, vector<16x8xbf16>, vector<16x8xf32> -> vector<16x8xf32>
    %87 = arith.truncf %86 : vector<16x8xf32> to vector<16x8xbf16>
    %c0_37 = arith.constant 0 : index
    %c1 = arith.constant 1 : index
    %c0_38 = arith.constant 0 : index
    %c0_39 = arith.constant 0 : index
    %88 = vector.load %arg8[%c0_37, %c1, %c0_38, %c0_39] : memref<2x4x8x32xbf16, #tpu.memory_space<vmem>>, vector<1x1x8x32xbf16>
    %89 = vector.shape_cast %88 : vector<1x1x8x32xbf16> to vector<8x32xbf16>
    %cst_40 = arith.constant dense<0.000000e+00> : vector<16x32xf32>
    %90 = tpu.matmul %87, %89, %cst_40 {dimension_numbers = #tpu.dot_dimension_numbers<[1], [0], [0], [1], [0, 0, 1, 1], [], []>} : vector<16x8xbf16>, vector<8x32xbf16>, vector<16x32xf32> -> vector<16x32xf32>
    %91 = arith.addf %66, %90 : vector<16x32xf32>
    %92 = vector.extract_strided_slice %42 {offsets = [0, 48], sizes = [16, 8], strides = [1, 1]} : vector<16x96xf32> to vector<16x8xf32>
    %93 = vector.extract_strided_slice %42 {offsets = [0, 56], sizes = [16, 8], strides = [1, 1]} : vector<16x96xf32> to vector<16x8xf32>
    %94 = vector.extract_strided_slice %42 {offsets = [0, 64], sizes = [16, 8], strides = [1, 1]} : vector<16x96xf32> to vector<16x8xf32>
    %95 = arith.truncf %92 : vector<16x8xf32> to vector<16x8xbf16>
    %96 = arith.truncf %93 : vector<16x8xf32> to vector<16x8xbf16>
    %cst_41 = arith.constant dense<0.000000e+00> : vector<16x16xf32>
    %97 = tpu.matmul %95, %96, %cst_41 {dimension_numbers = #tpu.dot_dimension_numbers<[1], [1], [0], [0], [0, 0, 1, 0], [], []>} : vector<16x8xbf16>, vector<16x8xbf16>, vector<16x16xf32> -> vector<16x16xf32>
    %cst_42 = arith.constant 0.353553385 : f32
    %98 = vector.broadcast %cst_42 : f32 to vector<16x16xf32>
    %99 = arith.mulf %97, %98 : vector<16x16xf32>
    %cst_43 = arith.constant dense<0xFF800000> : vector<16xf32>
    %100 = vector.multi_reduction <maximumf>, %99, %cst_43 [1] : vector<16x16xf32> to vector<16xf32>
    %101 = vector.shape_cast %100 : vector<16xf32> to vector<16x1xf32>
    %102 = vector.broadcast %101 : vector<16x1xf32> to vector<16x16xf32>
    %103 = arith.subf %99, %102 : vector<16x16xf32>
    %104 = math.exp %103 : vector<16x16xf32>
    %cst_44 = arith.constant dense<0.000000e+00> : vector<16xf32>
    %105 = vector.multi_reduction <add>, %104, %cst_44 [1] : vector<16x16xf32> to vector<16xf32>
    %106 = vector.shape_cast %105 : vector<16xf32> to vector<16x1xf32>
    %107 = vector.broadcast %106 : vector<16x1xf32> to vector<16x16xf32>
    %108 = arith.divf %104, %107 : vector<16x16xf32>
    %109 = arith.truncf %108 : vector<16x16xf32> to vector<16x16xbf16>
    %110 = arith.truncf %94 : vector<16x8xf32> to vector<16x8xbf16>
    %cst_45 = arith.constant dense<0.000000e+00> : vector<16x8xf32>
    %111 = tpu.matmul %109, %110, %cst_45 {dimension_numbers = #tpu.dot_dimension_numbers<[1], [0], [0], [1], [0, 0, 1, 1], [], []>} : vector<16x16xbf16>, vector<16x8xbf16>, vector<16x8xf32> -> vector<16x8xf32>
    %112 = arith.truncf %111 : vector<16x8xf32> to vector<16x8xbf16>
    %c0_46 = arith.constant 0 : index
    %c2 = arith.constant 2 : index
    %c0_47 = arith.constant 0 : index
    %c0_48 = arith.constant 0 : index
    %113 = vector.load %arg8[%c0_46, %c2, %c0_47, %c0_48] : memref<2x4x8x32xbf16, #tpu.memory_space<vmem>>, vector<1x1x8x32xbf16>
    %114 = vector.shape_cast %113 : vector<1x1x8x32xbf16> to vector<8x32xbf16>
    %cst_49 = arith.constant dense<0.000000e+00> : vector<16x32xf32>
    %115 = tpu.matmul %112, %114, %cst_49 {dimension_numbers = #tpu.dot_dimension_numbers<[1], [0], [0], [1], [0, 0, 1, 1], [], []>} : vector<16x8xbf16>, vector<8x32xbf16>, vector<16x32xf32> -> vector<16x32xf32>
    %116 = arith.addf %91, %115 : vector<16x32xf32>
    %117 = vector.extract_strided_slice %42 {offsets = [0, 72], sizes = [16, 8], strides = [1, 1]} : vector<16x96xf32> to vector<16x8xf32>
    %118 = vector.extract_strided_slice %42 {offsets = [0, 80], sizes = [16, 8], strides = [1, 1]} : vector<16x96xf32> to vector<16x8xf32>
    %119 = vector.extract_strided_slice %42 {offsets = [0, 88], sizes = [16, 8], strides = [1, 1]} : vector<16x96xf32> to vector<16x8xf32>
    %120 = arith.truncf %117 : vector<16x8xf32> to vector<16x8xbf16>
    %121 = arith.truncf %118 : vector<16x8xf32> to vector<16x8xbf16>
    %cst_50 = arith.constant dense<0.000000e+00> : vector<16x16xf32>
    %122 = tpu.matmul %120, %121, %cst_50 {dimension_numbers = #tpu.dot_dimension_numbers<[1], [1], [0], [0], [0, 0, 1, 0], [], []>} : vector<16x8xbf16>, vector<16x8xbf16>, vector<16x16xf32> -> vector<16x16xf32>
    %cst_51 = arith.constant 0.353553385 : f32
    %123 = vector.broadcast %cst_51 : f32 to vector<16x16xf32>
    %124 = arith.mulf %122, %123 : vector<16x16xf32>
    %cst_52 = arith.constant dense<0xFF800000> : vector<16xf32>
    %125 = vector.multi_reduction <maximumf>, %124, %cst_52 [1] : vector<16x16xf32> to vector<16xf32>
    %126 = vector.shape_cast %125 : vector<16xf32> to vector<16x1xf32>
    %127 = vector.broadcast %126 : vector<16x1xf32> to vector<16x16xf32>
    %128 = arith.subf %124, %127 : vector<16x16xf32>
    %129 = math.exp %128 : vector<16x16xf32>
    %cst_53 = arith.constant dense<0.000000e+00> : vector<16xf32>
    %130 = vector.multi_reduction <add>, %129, %cst_53 [1] : vector<16x16xf32> to vector<16xf32>
    %131 = vector.shape_cast %130 : vector<16xf32> to vector<16x1xf32>
    %132 = vector.broadcast %131 : vector<16x1xf32> to vector<16x16xf32>
    %133 = arith.divf %129, %132 : vector<16x16xf32>
    %134 = arith.truncf %133 : vector<16x16xf32> to vector<16x16xbf16>
    %135 = arith.truncf %119 : vector<16x8xf32> to vector<16x8xbf16>
    %cst_54 = arith.constant dense<0.000000e+00> : vector<16x8xf32>
    %136 = tpu.matmul %134, %135, %cst_54 {dimension_numbers = #tpu.dot_dimension_numbers<[1], [0], [0], [1], [0, 0, 1, 1], [], []>} : vector<16x16xbf16>, vector<16x8xbf16>, vector<16x8xf32> -> vector<16x8xf32>
    %137 = arith.truncf %136 : vector<16x8xf32> to vector<16x8xbf16>
    %c0_55 = arith.constant 0 : index
    %c3 = arith.constant 3 : index
    %c0_56 = arith.constant 0 : index
    %c0_57 = arith.constant 0 : index
    %138 = vector.load %arg8[%c0_55, %c3, %c0_56, %c0_57] : memref<2x4x8x32xbf16, #tpu.memory_space<vmem>>, vector<1x1x8x32xbf16>
    %139 = vector.shape_cast %138 : vector<1x1x8x32xbf16> to vector<8x32xbf16>
    %cst_58 = arith.constant dense<0.000000e+00> : vector<16x32xf32>
    %140 = tpu.matmul %137, %139, %cst_58 {dimension_numbers = #tpu.dot_dimension_numbers<[1], [0], [0], [1], [0, 0, 1, 1], [], []>} : vector<16x8xbf16>, vector<8x32xbf16>, vector<16x32xf32> -> vector<16x32xf32>
    %141 = arith.addf %116, %140 : vector<16x32xf32>
    %142 = arith.addf %8, %141 : vector<16x32xf32>
    %143 = vector.extract_strided_slice %10 {offsets = [4, 0], sizes = [1, 32], strides = [1, 1]} : vector<6x32xf32> to vector<1x32xf32>
    %144 = vector.broadcast %143 : vector<1x32xf32> to vector<16x32xf32>
    %145 = arith.addf %142, %144 : vector<16x32xf32>
    %146 = vector.extract_strided_slice %10 {offsets = [2, 0], sizes = [1, 32], strides = [1, 1]} : vector<6x32xf32> to vector<1x32xf32>
    %147 = vector.extract_strided_slice %10 {offsets = [3, 0], sizes = [1, 32], strides = [1, 1]} : vector<6x32xf32> to vector<1x32xf32>
    %cst_59 = arith.constant dense<0.000000e+00> : vector<16xf32>
    %148 = vector.multi_reduction <add>, %145, %cst_59 [1] : vector<16x32xf32> to vector<16xf32>
    %149 = vector.shape_cast %148 : vector<16xf32> to vector<16x1xf32>
    %cst_60 = arith.constant 3.200000e+01 : f32
    %150 = vector.broadcast %cst_60 : f32 to vector<16x1xf32>
    %151 = arith.divf %149, %150 : vector<16x1xf32>
    %152 = vector.broadcast %151 : vector<16x1xf32> to vector<16x32xf32>
    %153 = arith.subf %145, %152 : vector<16x32xf32>
    %154 = arith.mulf %153, %153 : vector<16x32xf32>
    %cst_61 = arith.constant dense<0.000000e+00> : vector<16xf32>
    %155 = vector.multi_reduction <add>, %154, %cst_61 [1] : vector<16x32xf32> to vector<16xf32>
    %156 = vector.shape_cast %155 : vector<16xf32> to vector<16x1xf32>
    %cst_62 = arith.constant 3.200000e+01 : f32
    %157 = vector.broadcast %cst_62 : f32 to vector<16x1xf32>
    %158 = arith.divf %156, %157 : vector<16x1xf32>
    %159 = vector.broadcast %151 : vector<16x1xf32> to vector<16x32xf32>
    %160 = arith.subf %145, %159 : vector<16x32xf32>
    %cst_63 = arith.constant 9.99999974E-6 : f32
    %161 = vector.broadcast %cst_63 : f32 to vector<16x1xf32>
    %162 = arith.addf %158, %161 : vector<16x1xf32>
    %163 = math.rsqrt %162 : vector<16x1xf32>
    %164 = vector.broadcast %163 : vector<16x1xf32> to vector<16x32xf32>
    %165 = arith.mulf %160, %164 : vector<16x32xf32>
    %166 = vector.broadcast %146 : vector<1x32xf32> to vector<16x32xf32>
    %167 = arith.mulf %165, %166 : vector<16x32xf32>
    %168 = vector.broadcast %147 : vector<1x32xf32> to vector<16x32xf32>
    %169 = arith.addf %167, %168 : vector<16x32xf32>
    %170 = arith.truncf %169 : vector<16x32xf32> to vector<16x32xbf16>
    %c0_64 = arith.constant 0 : index
    %c0_65 = arith.constant 0 : index
    %c0_66 = arith.constant 0 : index
    %171 = vector.load %arg9[%c0_64, %c0_65, %c0_66] : memref<2x32x128xbf16, #tpu.memory_space<vmem>>, vector<1x32x128xbf16>
    %172 = vector.shape_cast %171 : vector<1x32x128xbf16> to vector<32x128xbf16>
    %cst_67 = arith.constant dense<0.000000e+00> : vector<16x128xf32>
    %173 = tpu.matmul %170, %172, %cst_67 {dimension_numbers = #tpu.dot_dimension_numbers<[1], [0], [0], [1], [0, 0, 1, 1], [], []>} : vector<16x32xbf16>, vector<32x128xbf16>, vector<16x128xf32> -> vector<16x128xf32>
    %c0_68 = arith.constant 0 : index
    %c0_69 = arith.constant 0 : index
    %c0_70 = arith.constant 0 : index
    %174 = vector.load %arg10[%c0_68, %c0_69, %c0_70] : memref<2x1x128xf32, #tpu.memory_space<vmem>>, vector<1x1x128xf32>
    %175 = vector.shape_cast %174 : vector<1x1x128xf32> to vector<1x128xf32>
    %176 = vector.broadcast %175 : vector<1x128xf32> to vector<16x128xf32>
    %177 = arith.addf %173, %176 : vector<16x128xf32>
    %178 = arith.mulf %177, %177 : vector<16x128xf32>
    %179 = arith.mulf %177, %178 : vector<16x128xf32>
    %cst_71 = arith.constant 4.471500e-02 : f32
    %180 = vector.broadcast %cst_71 : f32 to vector<16x128xf32>
    %181 = arith.mulf %180, %179 : vector<16x128xf32>
    %182 = arith.addf %177, %181 : vector<16x128xf32>
    %cst_72 = arith.constant 0.797884583 : f32
    %183 = vector.broadcast %cst_72 : f32 to vector<16x128xf32>
    %184 = arith.mulf %183, %182 : vector<16x128xf32>
    %185 = math.tanh %184 : vector<16x128xf32>
    %cst_73 = arith.constant 1.000000e+00 : f32
    %186 = vector.broadcast %cst_73 : f32 to vector<16x128xf32>
    %187 = arith.addf %186, %185 : vector<16x128xf32>
    %cst_74 = arith.constant 5.000000e-01 : f32
    %188 = vector.broadcast %cst_74 : f32 to vector<16x128xf32>
    %189 = arith.mulf %188, %187 : vector<16x128xf32>
    %190 = arith.mulf %177, %189 : vector<16x128xf32>
    %191 = arith.truncf %190 : vector<16x128xf32> to vector<16x128xbf16>
    %c0_75 = arith.constant 0 : index
    %c0_76 = arith.constant 0 : index
    %c0_77 = arith.constant 0 : index
    %192 = vector.load %arg11[%c0_75, %c0_76, %c0_77] : memref<2x128x32xbf16, #tpu.memory_space<vmem>>, vector<1x128x32xbf16>
    %193 = vector.shape_cast %192 : vector<1x128x32xbf16> to vector<128x32xbf16>
    %cst_78 = arith.constant dense<0.000000e+00> : vector<16x32xf32>
    %194 = tpu.matmul %191, %193, %cst_78 {dimension_numbers = #tpu.dot_dimension_numbers<[1], [0], [0], [1], [0, 0, 1, 1], [], []>} : vector<16x128xbf16>, vector<128x32xbf16>, vector<16x32xf32> -> vector<16x32xf32>
    %195 = vector.extract_strided_slice %10 {offsets = [5, 0], sizes = [1, 32], strides = [1, 1]} : vector<6x32xf32> to vector<1x32xf32>
    %196 = vector.broadcast %195 : vector<1x32xf32> to vector<16x32xf32>
    %197 = arith.addf %194, %196 : vector<16x32xf32>
    %198 = arith.addf %145, %197 : vector<16x32xf32>
    %c1_79 = arith.constant 1 : index
    %c0_80 = arith.constant 0 : index
    %c0_81 = arith.constant 0 : index
    %199 = vector.load %arg5[%c1_79, %c0_80, %c0_81] : memref<2x6x32xf32, #tpu.memory_space<vmem>>, vector<1x6x32xf32>
    %200 = vector.shape_cast %199 : vector<1x6x32xf32> to vector<6x32xf32>
    %201 = vector.extract_strided_slice %200 {offsets = [0, 0], sizes = [1, 32], strides = [1, 1]} : vector<6x32xf32> to vector<1x32xf32>
    %202 = vector.extract_strided_slice %200 {offsets = [1, 0], sizes = [1, 32], strides = [1, 1]} : vector<6x32xf32> to vector<1x32xf32>
    %cst_82 = arith.constant dense<0.000000e+00> : vector<16xf32>
    %203 = vector.multi_reduction <add>, %198, %cst_82 [1] : vector<16x32xf32> to vector<16xf32>
    %204 = vector.shape_cast %203 : vector<16xf32> to vector<16x1xf32>
    %cst_83 = arith.constant 3.200000e+01 : f32
    %205 = vector.broadcast %cst_83 : f32 to vector<16x1xf32>
    %206 = arith.divf %204, %205 : vector<16x1xf32>
    %207 = vector.broadcast %206 : vector<16x1xf32> to vector<16x32xf32>
    %208 = arith.subf %198, %207 : vector<16x32xf32>
    %209 = arith.mulf %208, %208 : vector<16x32xf32>
    %cst_84 = arith.constant dense<0.000000e+00> : vector<16xf32>
    %210 = vector.multi_reduction <add>, %209, %cst_84 [1] : vector<16x32xf32> to vector<16xf32>
    %211 = vector.shape_cast %210 : vector<16xf32> to vector<16x1xf32>
    %cst_85 = arith.constant 3.200000e+01 : f32
    %212 = vector.broadcast %cst_85 : f32 to vector<16x1xf32>
    %213 = arith.divf %211, %212 : vector<16x1xf32>
    %214 = vector.broadcast %206 : vector<16x1xf32> to vector<16x32xf32>
    %215 = arith.subf %198, %214 : vector<16x32xf32>
    %cst_86 = arith.constant 9.99999974E-6 : f32
    %216 = vector.broadcast %cst_86 : f32 to vector<16x1xf32>
    %217 = arith.addf %213, %216 : vector<16x1xf32>
    %218 = math.rsqrt %217 : vector<16x1xf32>
    %219 = vector.broadcast %218 : vector<16x1xf32> to vector<16x32xf32>
    %220 = arith.mulf %215, %219 : vector<16x32xf32>
    %221 = vector.broadcast %201 : vector<1x32xf32> to vector<16x32xf32>
    %222 = arith.mulf %220, %221 : vector<16x32xf32>
    %223 = vector.broadcast %202 : vector<1x32xf32> to vector<16x32xf32>
    %224 = arith.addf %222, %223 : vector<16x32xf32>
    %225 = arith.truncf %224 : vector<16x32xf32> to vector<16x32xbf16>
    %c1_87 = arith.constant 1 : index
    %c0_88 = arith.constant 0 : index
    %c0_89 = arith.constant 0 : index
    %226 = vector.load %arg6[%c1_87, %c0_88, %c0_89] : memref<2x32x96xbf16, #tpu.memory_space<vmem>>, vector<1x32x96xbf16>
    %227 = vector.shape_cast %226 : vector<1x32x96xbf16> to vector<32x96xbf16>
    %cst_90 = arith.constant dense<0.000000e+00> : vector<16x96xf32>
    %228 = tpu.matmul %225, %227, %cst_90 {dimension_numbers = #tpu.dot_dimension_numbers<[1], [0], [0], [1], [0, 0, 1, 1], [], []>} : vector<16x32xbf16>, vector<32x96xbf16>, vector<16x96xf32> -> vector<16x96xf32>
    %c1_91 = arith.constant 1 : index
    %c0_92 = arith.constant 0 : index
    %c0_93 = arith.constant 0 : index
    %229 = vector.load %arg7[%c1_91, %c0_92, %c0_93] : memref<2x1x96xf32, #tpu.memory_space<vmem>>, vector<1x1x96xf32>
    %230 = vector.shape_cast %229 : vector<1x1x96xf32> to vector<1x96xf32>
    %231 = vector.broadcast %230 : vector<1x96xf32> to vector<16x96xf32>
    %232 = arith.addf %228, %231 : vector<16x96xf32>
    %233 = vector.extract_strided_slice %232 {offsets = [0, 0], sizes = [16, 8], strides = [1, 1]} : vector<16x96xf32> to vector<16x8xf32>
    %234 = vector.extract_strided_slice %232 {offsets = [0, 8], sizes = [16, 8], strides = [1, 1]} : vector<16x96xf32> to vector<16x8xf32>
    %235 = vector.extract_strided_slice %232 {offsets = [0, 16], sizes = [16, 8], strides = [1, 1]} : vector<16x96xf32> to vector<16x8xf32>
    %236 = arith.truncf %233 : vector<16x8xf32> to vector<16x8xbf16>
    %237 = arith.truncf %234 : vector<16x8xf32> to vector<16x8xbf16>
    %cst_94 = arith.constant dense<0.000000e+00> : vector<16x16xf32>
    %238 = tpu.matmul %236, %237, %cst_94 {dimension_numbers = #tpu.dot_dimension_numbers<[1], [1], [0], [0], [0, 0, 1, 0], [], []>} : vector<16x8xbf16>, vector<16x8xbf16>, vector<16x16xf32> -> vector<16x16xf32>
    %cst_95 = arith.constant 0.353553385 : f32
    %239 = vector.broadcast %cst_95 : f32 to vector<16x16xf32>
    %240 = arith.mulf %238, %239 : vector<16x16xf32>
    %cst_96 = arith.constant dense<0xFF800000> : vector<16xf32>
    %241 = vector.multi_reduction <maximumf>, %240, %cst_96 [1] : vector<16x16xf32> to vector<16xf32>
    %242 = vector.shape_cast %241 : vector<16xf32> to vector<16x1xf32>
    %243 = vector.broadcast %242 : vector<16x1xf32> to vector<16x16xf32>
    %244 = arith.subf %240, %243 : vector<16x16xf32>
    %245 = math.exp %244 : vector<16x16xf32>
    %cst_97 = arith.constant dense<0.000000e+00> : vector<16xf32>
    %246 = vector.multi_reduction <add>, %245, %cst_97 [1] : vector<16x16xf32> to vector<16xf32>
    %247 = vector.shape_cast %246 : vector<16xf32> to vector<16x1xf32>
    %248 = vector.broadcast %247 : vector<16x1xf32> to vector<16x16xf32>
    %249 = arith.divf %245, %248 : vector<16x16xf32>
    %250 = arith.truncf %249 : vector<16x16xf32> to vector<16x16xbf16>
    %251 = arith.truncf %235 : vector<16x8xf32> to vector<16x8xbf16>
    %cst_98 = arith.constant dense<0.000000e+00> : vector<16x8xf32>
    %252 = tpu.matmul %250, %251, %cst_98 {dimension_numbers = #tpu.dot_dimension_numbers<[1], [0], [0], [1], [0, 0, 1, 1], [], []>} : vector<16x16xbf16>, vector<16x8xbf16>, vector<16x8xf32> -> vector<16x8xf32>
    %253 = arith.truncf %252 : vector<16x8xf32> to vector<16x8xbf16>
    %c1_99 = arith.constant 1 : index
    %c0_100 = arith.constant 0 : index
    %c0_101 = arith.constant 0 : index
    %c0_102 = arith.constant 0 : index
    %254 = vector.load %arg8[%c1_99, %c0_100, %c0_101, %c0_102] : memref<2x4x8x32xbf16, #tpu.memory_space<vmem>>, vector<1x1x8x32xbf16>
    %255 = vector.shape_cast %254 : vector<1x1x8x32xbf16> to vector<8x32xbf16>
    %cst_103 = arith.constant dense<0.000000e+00> : vector<16x32xf32>
    %256 = tpu.matmul %253, %255, %cst_103 {dimension_numbers = #tpu.dot_dimension_numbers<[1], [0], [0], [1], [0, 0, 1, 1], [], []>} : vector<16x8xbf16>, vector<8x32xbf16>, vector<16x32xf32> -> vector<16x32xf32>
    %257 = vector.extract_strided_slice %232 {offsets = [0, 24], sizes = [16, 8], strides = [1, 1]} : vector<16x96xf32> to vector<16x8xf32>
    %258 = vector.extract_strided_slice %232 {offsets = [0, 32], sizes = [16, 8], strides = [1, 1]} : vector<16x96xf32> to vector<16x8xf32>
    %259 = vector.extract_strided_slice %232 {offsets = [0, 40], sizes = [16, 8], strides = [1, 1]} : vector<16x96xf32> to vector<16x8xf32>
    %260 = arith.truncf %257 : vector<16x8xf32> to vector<16x8xbf16>
    %261 = arith.truncf %258 : vector<16x8xf32> to vector<16x8xbf16>
    %cst_104 = arith.constant dense<0.000000e+00> : vector<16x16xf32>
    %262 = tpu.matmul %260, %261, %cst_104 {dimension_numbers = #tpu.dot_dimension_numbers<[1], [1], [0], [0], [0, 0, 1, 0], [], []>} : vector<16x8xbf16>, vector<16x8xbf16>, vector<16x16xf32> -> vector<16x16xf32>
    %cst_105 = arith.constant 0.353553385 : f32
    %263 = vector.broadcast %cst_105 : f32 to vector<16x16xf32>
    %264 = arith.mulf %262, %263 : vector<16x16xf32>
    %cst_106 = arith.constant dense<0xFF800000> : vector<16xf32>
    %265 = vector.multi_reduction <maximumf>, %264, %cst_106 [1] : vector<16x16xf32> to vector<16xf32>
    %266 = vector.shape_cast %265 : vector<16xf32> to vector<16x1xf32>
    %267 = vector.broadcast %266 : vector<16x1xf32> to vector<16x16xf32>
    %268 = arith.subf %264, %267 : vector<16x16xf32>
    %269 = math.exp %268 : vector<16x16xf32>
    %cst_107 = arith.constant dense<0.000000e+00> : vector<16xf32>
    %270 = vector.multi_reduction <add>, %269, %cst_107 [1] : vector<16x16xf32> to vector<16xf32>
    %271 = vector.shape_cast %270 : vector<16xf32> to vector<16x1xf32>
    %272 = vector.broadcast %271 : vector<16x1xf32> to vector<16x16xf32>
    %273 = arith.divf %269, %272 : vector<16x16xf32>
    %274 = arith.truncf %273 : vector<16x16xf32> to vector<16x16xbf16>
    %275 = arith.truncf %259 : vector<16x8xf32> to vector<16x8xbf16>
    %cst_108 = arith.constant dense<0.000000e+00> : vector<16x8xf32>
    %276 = tpu.matmul %274, %275, %cst_108 {dimension_numbers = #tpu.dot_dimension_numbers<[1], [0], [0], [1], [0, 0, 1, 1], [], []>} : vector<16x16xbf16>, vector<16x8xbf16>, vector<16x8xf32> -> vector<16x8xf32>
    %277 = arith.truncf %276 : vector<16x8xf32> to vector<16x8xbf16>
    %c1_109 = arith.constant 1 : index
    %c1_110 = arith.constant 1 : index
    %c0_111 = arith.constant 0 : index
    %c0_112 = arith.constant 0 : index
    %278 = vector.load %arg8[%c1_109, %c1_110, %c0_111, %c0_112] : memref<2x4x8x32xbf16, #tpu.memory_space<vmem>>, vector<1x1x8x32xbf16>
    %279 = vector.shape_cast %278 : vector<1x1x8x32xbf16> to vector<8x32xbf16>
    %cst_113 = arith.constant dense<0.000000e+00> : vector<16x32xf32>
    %280 = tpu.matmul %277, %279, %cst_113 {dimension_numbers = #tpu.dot_dimension_numbers<[1], [0], [0], [1], [0, 0, 1, 1], [], []>} : vector<16x8xbf16>, vector<8x32xbf16>, vector<16x32xf32> -> vector<16x32xf32>
    %281 = arith.addf %256, %280 : vector<16x32xf32>
    %282 = vector.extract_strided_slice %232 {offsets = [0, 48], sizes = [16, 8], strides = [1, 1]} : vector<16x96xf32> to vector<16x8xf32>
    %283 = vector.extract_strided_slice %232 {offsets = [0, 56], sizes = [16, 8], strides = [1, 1]} : vector<16x96xf32> to vector<16x8xf32>
    %284 = vector.extract_strided_slice %232 {offsets = [0, 64], sizes = [16, 8], strides = [1, 1]} : vector<16x96xf32> to vector<16x8xf32>
    %285 = arith.truncf %282 : vector<16x8xf32> to vector<16x8xbf16>
    %286 = arith.truncf %283 : vector<16x8xf32> to vector<16x8xbf16>
    %cst_114 = arith.constant dense<0.000000e+00> : vector<16x16xf32>
    %287 = tpu.matmul %285, %286, %cst_114 {dimension_numbers = #tpu.dot_dimension_numbers<[1], [1], [0], [0], [0, 0, 1, 0], [], []>} : vector<16x8xbf16>, vector<16x8xbf16>, vector<16x16xf32> -> vector<16x16xf32>
    %cst_115 = arith.constant 0.353553385 : f32
    %288 = vector.broadcast %cst_115 : f32 to vector<16x16xf32>
    %289 = arith.mulf %287, %288 : vector<16x16xf32>
    %cst_116 = arith.constant dense<0xFF800000> : vector<16xf32>
    %290 = vector.multi_reduction <maximumf>, %289, %cst_116 [1] : vector<16x16xf32> to vector<16xf32>
    %291 = vector.shape_cast %290 : vector<16xf32> to vector<16x1xf32>
    %292 = vector.broadcast %291 : vector<16x1xf32> to vector<16x16xf32>
    %293 = arith.subf %289, %292 : vector<16x16xf32>
    %294 = math.exp %293 : vector<16x16xf32>
    %cst_117 = arith.constant dense<0.000000e+00> : vector<16xf32>
    %295 = vector.multi_reduction <add>, %294, %cst_117 [1] : vector<16x16xf32> to vector<16xf32>
    %296 = vector.shape_cast %295 : vector<16xf32> to vector<16x1xf32>
    %297 = vector.broadcast %296 : vector<16x1xf32> to vector<16x16xf32>
    %298 = arith.divf %294, %297 : vector<16x16xf32>
    %299 = arith.truncf %298 : vector<16x16xf32> to vector<16x16xbf16>
    %300 = arith.truncf %284 : vector<16x8xf32> to vector<16x8xbf16>
    %cst_118 = arith.constant dense<0.000000e+00> : vector<16x8xf32>
    %301 = tpu.matmul %299, %300, %cst_118 {dimension_numbers = #tpu.dot_dimension_numbers<[1], [0], [0], [1], [0, 0, 1, 1], [], []>} : vector<16x16xbf16>, vector<16x8xbf16>, vector<16x8xf32> -> vector<16x8xf32>
    %302 = arith.truncf %301 : vector<16x8xf32> to vector<16x8xbf16>
    %c1_119 = arith.constant 1 : index
    %c2_120 = arith.constant 2 : index
    %c0_121 = arith.constant 0 : index
    %c0_122 = arith.constant 0 : index
    %303 = vector.load %arg8[%c1_119, %c2_120, %c0_121, %c0_122] : memref<2x4x8x32xbf16, #tpu.memory_space<vmem>>, vector<1x1x8x32xbf16>
    %304 = vector.shape_cast %303 : vector<1x1x8x32xbf16> to vector<8x32xbf16>
    %cst_123 = arith.constant dense<0.000000e+00> : vector<16x32xf32>
    %305 = tpu.matmul %302, %304, %cst_123 {dimension_numbers = #tpu.dot_dimension_numbers<[1], [0], [0], [1], [0, 0, 1, 1], [], []>} : vector<16x8xbf16>, vector<8x32xbf16>, vector<16x32xf32> -> vector<16x32xf32>
    %306 = arith.addf %281, %305 : vector<16x32xf32>
    %307 = vector.extract_strided_slice %232 {offsets = [0, 72], sizes = [16, 8], strides = [1, 1]} : vector<16x96xf32> to vector<16x8xf32>
    %308 = vector.extract_strided_slice %232 {offsets = [0, 80], sizes = [16, 8], strides = [1, 1]} : vector<16x96xf32> to vector<16x8xf32>
    %309 = vector.extract_strided_slice %232 {offsets = [0, 88], sizes = [16, 8], strides = [1, 1]} : vector<16x96xf32> to vector<16x8xf32>
    %310 = arith.truncf %307 : vector<16x8xf32> to vector<16x8xbf16>
    %311 = arith.truncf %308 : vector<16x8xf32> to vector<16x8xbf16>
    %cst_124 = arith.constant dense<0.000000e+00> : vector<16x16xf32>
    %312 = tpu.matmul %310, %311, %cst_124 {dimension_numbers = #tpu.dot_dimension_numbers<[1], [1], [0], [0], [0, 0, 1, 0], [], []>} : vector<16x8xbf16>, vector<16x8xbf16>, vector<16x16xf32> -> vector<16x16xf32>
    %cst_125 = arith.constant 0.353553385 : f32
    %313 = vector.broadcast %cst_125 : f32 to vector<16x16xf32>
    %314 = arith.mulf %312, %313 : vector<16x16xf32>
    %cst_126 = arith.constant dense<0xFF800000> : vector<16xf32>
    %315 = vector.multi_reduction <maximumf>, %314, %cst_126 [1] : vector<16x16xf32> to vector<16xf32>
    %316 = vector.shape_cast %315 : vector<16xf32> to vector<16x1xf32>
    %317 = vector.broadcast %316 : vector<16x1xf32> to vector<16x16xf32>
    %318 = arith.subf %314, %317 : vector<16x16xf32>
    %319 = math.exp %318 : vector<16x16xf32>
    %cst_127 = arith.constant dense<0.000000e+00> : vector<16xf32>
    %320 = vector.multi_reduction <add>, %319, %cst_127 [1] : vector<16x16xf32> to vector<16xf32>
    %321 = vector.shape_cast %320 : vector<16xf32> to vector<16x1xf32>
    %322 = vector.broadcast %321 : vector<16x1xf32> to vector<16x16xf32>
    %323 = arith.divf %319, %322 : vector<16x16xf32>
    %324 = arith.truncf %323 : vector<16x16xf32> to vector<16x16xbf16>
    %325 = arith.truncf %309 : vector<16x8xf32> to vector<16x8xbf16>
    %cst_128 = arith.constant dense<0.000000e+00> : vector<16x8xf32>
    %326 = tpu.matmul %324, %325, %cst_128 {dimension_numbers = #tpu.dot_dimension_numbers<[1], [0], [0], [1], [0, 0, 1, 1], [], []>} : vector<16x16xbf16>, vector<16x8xbf16>, vector<16x8xf32> -> vector<16x8xf32>
    %327 = arith.truncf %326 : vector<16x8xf32> to vector<16x8xbf16>
    %c1_129 = arith.constant 1 : index
    %c3_130 = arith.constant 3 : index
    %c0_131 = arith.constant 0 : index
    %c0_132 = arith.constant 0 : index
    %328 = vector.load %arg8[%c1_129, %c3_130, %c0_131, %c0_132] : memref<2x4x8x32xbf16, #tpu.memory_space<vmem>>, vector<1x1x8x32xbf16>
    %329 = vector.shape_cast %328 : vector<1x1x8x32xbf16> to vector<8x32xbf16>
    %cst_133 = arith.constant dense<0.000000e+00> : vector<16x32xf32>
    %330 = tpu.matmul %327, %329, %cst_133 {dimension_numbers = #tpu.dot_dimension_numbers<[1], [0], [0], [1], [0, 0, 1, 1], [], []>} : vector<16x8xbf16>, vector<8x32xbf16>, vector<16x32xf32> -> vector<16x32xf32>
    %331 = arith.addf %306, %330 : vector<16x32xf32>
    %332 = arith.addf %198, %331 : vector<16x32xf32>
    %333 = vector.extract_strided_slice %200 {offsets = [4, 0], sizes = [1, 32], strides = [1, 1]} : vector<6x32xf32> to vector<1x32xf32>
    %334 = vector.broadcast %333 : vector<1x32xf32> to vector<16x32xf32>
    %335 = arith.addf %332, %334 : vector<16x32xf32>
    %336 = vector.extract_strided_slice %200 {offsets = [2, 0], sizes = [1, 32], strides = [1, 1]} : vector<6x32xf32> to vector<1x32xf32>
    %337 = vector.extract_strided_slice %200 {offsets = [3, 0], sizes = [1, 32], strides = [1, 1]} : vector<6x32xf32> to vector<1x32xf32>
    %cst_134 = arith.constant dense<0.000000e+00> : vector<16xf32>
    %338 = vector.multi_reduction <add>, %335, %cst_134 [1] : vector<16x32xf32> to vector<16xf32>
    %339 = vector.shape_cast %338 : vector<16xf32> to vector<16x1xf32>
    %cst_135 = arith.constant 3.200000e+01 : f32
    %340 = vector.broadcast %cst_135 : f32 to vector<16x1xf32>
    %341 = arith.divf %339, %340 : vector<16x1xf32>
    %342 = vector.broadcast %341 : vector<16x1xf32> to vector<16x32xf32>
    %343 = arith.subf %335, %342 : vector<16x32xf32>
    %344 = arith.mulf %343, %343 : vector<16x32xf32>
    %cst_136 = arith.constant dense<0.000000e+00> : vector<16xf32>
    %345 = vector.multi_reduction <add>, %344, %cst_136 [1] : vector<16x32xf32> to vector<16xf32>
    %346 = vector.shape_cast %345 : vector<16xf32> to vector<16x1xf32>
    %cst_137 = arith.constant 3.200000e+01 : f32
    %347 = vector.broadcast %cst_137 : f32 to vector<16x1xf32>
    %348 = arith.divf %346, %347 : vector<16x1xf32>
    %349 = vector.broadcast %341 : vector<16x1xf32> to vector<16x32xf32>
    %350 = arith.subf %335, %349 : vector<16x32xf32>
    %cst_138 = arith.constant 9.99999974E-6 : f32
    %351 = vector.broadcast %cst_138 : f32 to vector<16x1xf32>
    %352 = arith.addf %348, %351 : vector<16x1xf32>
    %353 = math.rsqrt %352 : vector<16x1xf32>
    %354 = vector.broadcast %353 : vector<16x1xf32> to vector<16x32xf32>
    %355 = arith.mulf %350, %354 : vector<16x32xf32>
    %356 = vector.broadcast %336 : vector<1x32xf32> to vector<16x32xf32>
    %357 = arith.mulf %355, %356 : vector<16x32xf32>
    %358 = vector.broadcast %337 : vector<1x32xf32> to vector<16x32xf32>
    %359 = arith.addf %357, %358 : vector<16x32xf32>
    %360 = arith.truncf %359 : vector<16x32xf32> to vector<16x32xbf16>
    %c1_139 = arith.constant 1 : index
    %c0_140 = arith.constant 0 : index
    %c0_141 = arith.constant 0 : index
    %361 = vector.load %arg9[%c1_139, %c0_140, %c0_141] : memref<2x32x128xbf16, #tpu.memory_space<vmem>>, vector<1x32x128xbf16>
    %362 = vector.shape_cast %361 : vector<1x32x128xbf16> to vector<32x128xbf16>
    %cst_142 = arith.constant dense<0.000000e+00> : vector<16x128xf32>
    %363 = tpu.matmul %360, %362, %cst_142 {dimension_numbers = #tpu.dot_dimension_numbers<[1], [0], [0], [1], [0, 0, 1, 1], [], []>} : vector<16x32xbf16>, vector<32x128xbf16>, vector<16x128xf32> -> vector<16x128xf32>
    %c1_143 = arith.constant 1 : index
    %c0_144 = arith.constant 0 : index
    %c0_145 = arith.constant 0 : index
    %364 = vector.load %arg10[%c1_143, %c0_144, %c0_145] : memref<2x1x128xf32, #tpu.memory_space<vmem>>, vector<1x1x128xf32>
    %365 = vector.shape_cast %364 : vector<1x1x128xf32> to vector<1x128xf32>
    %366 = vector.broadcast %365 : vector<1x128xf32> to vector<16x128xf32>
    %367 = arith.addf %363, %366 : vector<16x128xf32>
    %368 = arith.mulf %367, %367 : vector<16x128xf32>
    %369 = arith.mulf %367, %368 : vector<16x128xf32>
    %cst_146 = arith.constant 4.471500e-02 : f32
    %370 = vector.broadcast %cst_146 : f32 to vector<16x128xf32>
    %371 = arith.mulf %370, %369 : vector<16x128xf32>
    %372 = arith.addf %367, %371 : vector<16x128xf32>
    %cst_147 = arith.constant 0.797884583 : f32
    %373 = vector.broadcast %cst_147 : f32 to vector<16x128xf32>
    %374 = arith.mulf %373, %372 : vector<16x128xf32>
    %375 = math.tanh %374 : vector<16x128xf32>
    %cst_148 = arith.constant 1.000000e+00 : f32
    %376 = vector.broadcast %cst_148 : f32 to vector<16x128xf32>
    %377 = arith.addf %376, %375 : vector<16x128xf32>
    %cst_149 = arith.constant 5.000000e-01 : f32
    %378 = vector.broadcast %cst_149 : f32 to vector<16x128xf32>
    %379 = arith.mulf %378, %377 : vector<16x128xf32>
    %380 = arith.mulf %367, %379 : vector<16x128xf32>
    %381 = arith.truncf %380 : vector<16x128xf32> to vector<16x128xbf16>
    %c1_150 = arith.constant 1 : index
    %c0_151 = arith.constant 0 : index
    %c0_152 = arith.constant 0 : index
    %382 = vector.load %arg11[%c1_150, %c0_151, %c0_152] : memref<2x128x32xbf16, #tpu.memory_space<vmem>>, vector<1x128x32xbf16>
    %383 = vector.shape_cast %382 : vector<1x128x32xbf16> to vector<128x32xbf16>
    %cst_153 = arith.constant dense<0.000000e+00> : vector<16x32xf32>
    %384 = tpu.matmul %381, %383, %cst_153 {dimension_numbers = #tpu.dot_dimension_numbers<[1], [0], [0], [1], [0, 0, 1, 1], [], []>} : vector<16x128xbf16>, vector<128x32xbf16>, vector<16x32xf32> -> vector<16x32xf32>
    %385 = vector.extract_strided_slice %200 {offsets = [5, 0], sizes = [1, 32], strides = [1, 1]} : vector<6x32xf32> to vector<1x32xf32>
    %386 = vector.broadcast %385 : vector<1x32xf32> to vector<16x32xf32>
    %387 = arith.addf %384, %386 : vector<16x32xf32>
    %388 = arith.addf %335, %387 : vector<16x32xf32>
    %c0_154 = arith.constant 0 : index
    %c0_155 = arith.constant 0 : index
    %389 = vector.load %arg12[%c0_154, %c0_155] : memref<32x128xbf16, #tpu.memory_space<vmem>>, vector<32x128xbf16>
    %c0_156 = arith.constant 0 : index
    %c0_157 = arith.constant 0 : index
    %390 = vector.load %arg13[%c0_156, %c0_157] : memref<1x128xf32, #tpu.memory_space<vmem>>, vector<1x128xf32>
    %391 = arith.truncf %388 : vector<16x32xf32> to vector<16x32xbf16>
    %cst_158 = arith.constant dense<0.000000e+00> : vector<16x128xf32>
    %392 = tpu.matmul %391, %389, %cst_158 {dimension_numbers = #tpu.dot_dimension_numbers<[1], [0], [0], [1], [0, 0, 1, 1], [], []>} : vector<16x32xbf16>, vector<32x128xbf16>, vector<16x128xf32> -> vector<16x128xf32>
    %393 = vector.broadcast %390 : vector<1x128xf32> to vector<16x128xf32>
    %394 = arith.addf %392, %393 : vector<16x128xf32>
    %cst_159 = arith.constant 0.000000e+00 : f32
    %395 = vector.broadcast %cst_159 : f32 to vector<16x128xf32>
    %396 = arith.maximumf %394, %395 : vector<16x128xf32>
    %397 = vector.extract_strided_slice %396 {offsets = [0, 0], sizes = [16, 32], strides = [1, 1]} : vector<16x128xf32> to vector<16x32xf32>
    %398 = vector.extract_strided_slice %396 {offsets = [0, 32], sizes = [16, 32], strides = [1, 1]} : vector<16x128xf32> to vector<16x32xf32>
    %399 = vector.extract_strided_slice %396 {offsets = [0, 64], sizes = [16, 32], strides = [1, 1]} : vector<16x128xf32> to vector<16x32xf32>
    %400 = vector.extract_strided_slice %396 {offsets = [0, 96], sizes = [16, 32], strides = [1, 1]} : vector<16x128xf32> to vector<16x32xf32>
    %401 = tpu.concatenate %397, %398, %399, %400 in 0 : vector<16x32xf32>, vector<16x32xf32>, vector<16x32xf32>, vector<16x32xf32> -> vector<64x32xf32>
    %c0_160 = arith.constant 0 : index
    %c0_161 = arith.constant 0 : index
    %402 = vector.load %arg14[%c0_160, %c0_161] : memref<32x128xbf16, #tpu.memory_space<vmem>>, vector<32x128xbf16>
    %c0_162 = arith.constant 0 : index
    %c0_163 = arith.constant 0 : index
    %403 = vector.load %arg15[%c0_162, %c0_163] : memref<1x128xf32, #tpu.memory_space<vmem>>, vector<1x128xf32>
    %404 = arith.truncf %401 : vector<64x32xf32> to vector<64x32xbf16>
    %cst_164 = arith.constant dense<0.000000e+00> : vector<64x128xf32>
    %405 = tpu.matmul %404, %402, %cst_164 {dimension_numbers = #tpu.dot_dimension_numbers<[1], [0], [0], [1], [0, 0, 1, 1], [], []>} : vector<64x32xbf16>, vector<32x128xbf16>, vector<64x128xf32> -> vector<64x128xf32>
    %406 = vector.broadcast %403 : vector<1x128xf32> to vector<64x128xf32>
    %407 = arith.addf %405, %406 : vector<64x128xf32>
    %cst_165 = arith.constant 0.000000e+00 : f32
    %408 = vector.broadcast %cst_165 : f32 to vector<64x128xf32>
    %409 = arith.maximumf %407, %408 : vector<64x128xf32>
    %410 = vector.extract_strided_slice %409 {offsets = [0, 0], sizes = [64, 32], strides = [1, 1]} : vector<64x128xf32> to vector<64x32xf32>
    %411 = vector.extract_strided_slice %409 {offsets = [0, 32], sizes = [64, 32], strides = [1, 1]} : vector<64x128xf32> to vector<64x32xf32>
    %412 = vector.extract_strided_slice %409 {offsets = [0, 64], sizes = [64, 32], strides = [1, 1]} : vector<64x128xf32> to vector<64x32xf32>
    %413 = vector.extract_strided_slice %409 {offsets = [0, 96], sizes = [64, 32], strides = [1, 1]} : vector<64x128xf32> to vector<64x32xf32>
    %414 = tpu.concatenate %410, %411, %412, %413 in 0 : vector<64x32xf32>, vector<64x32xf32>, vector<64x32xf32>, vector<64x32xf32> -> vector<256x32xf32>
    %c0_166 = arith.constant 0 : index
    %c0_167 = arith.constant 0 : index
    %415 = vector.load %arg16[%c0_166, %c0_167] : memref<32x14xbf16, #tpu.memory_space<vmem>>, vector<32x14xbf16>
    %c0_168 = arith.constant 0 : index
    %c0_169 = arith.constant 0 : index
    %416 = vector.load %arg17[%c0_168, %c0_169] : memref<1x14xf32, #tpu.memory_space<vmem>>, vector<1x14xf32>
    %417 = arith.truncf %414 : vector<256x32xf32> to vector<256x32xbf16>
    %cst_170 = arith.constant dense<0.000000e+00> : vector<256x14xf32>
    %418 = tpu.matmul %417, %415, %cst_170 {dimension_numbers = #tpu.dot_dimension_numbers<[1], [0], [0], [1], [0, 0, 1, 1], [], []>} : vector<256x32xbf16>, vector<32x14xbf16>, vector<256x14xf32> -> vector<256x14xf32>
    %419 = vector.broadcast %416 : vector<1x14xf32> to vector<256x14xf32>
    %420 = arith.addf %418, %419 : vector<256x14xf32>
    %c0_171 = arith.constant 0 : index
    %c0_172 = arith.constant 0 : index
    %421 = vector.load %arg18[%c0_171, %c0_172] : memref<256x14xf32, #tpu.memory_space<vmem>>, vector<256x14xf32>
    tpu.vector_store %arg18[%c0_171, %c0_172], %420 {strides = array<i32>} : memref<256x14xf32, #tpu.memory_space<vmem>>, vector<256x14xf32>,
    return
  }
  func.func @transform_0(%arg0: i32) -> (i32, i32) {
    %c0_i32 = arith.constant 0 : i32
    %c0_i32_0 = arith.constant 0 : i32
    return %arg0, %c0_i32 : i32, i32
  }
  func.func @transform_1(%arg0: i32) -> (i32, i32) {
    %c0_i32 = arith.constant 0 : i32
    %c0_i32_0 = arith.constant 0 : i32
    %c0_i32_1 = arith.constant 0 : i32
    return %c0_i32, %c0_i32_0 : i32, i32
  }
  func.func @transform_2(%arg0: i32) -> (i32, i32) {
    %c0_i32 = arith.constant 0 : i32
    %c0_i32_0 = arith.constant 0 : i32
    %c0_i32_1 = arith.constant 0 : i32
    return %c0_i32, %c0_i32_0 : i32, i32
  }
  func.func @transform_3(%arg0: i32) -> (i32, i32) {
    %c0_i32 = arith.constant 0 : i32
    %c0_i32_0 = arith.constant 0 : i32
    %c0_i32_1 = arith.constant 0 : i32
    return %c0_i32, %c0_i32_0 : i32, i32
  }
  func.func @transform_4(%arg0: i32) -> (i32, i32, i32) {
    %c0_i32 = arith.constant 0 : i32
    %c0_i32_0 = arith.constant 0 : i32
    %c0_i32_1 = arith.constant 0 : i32
    %c0_i32_2 = arith.constant 0 : i32
    return %c0_i32, %c0_i32_0, %c0_i32_1 : i32, i32, i32
  }
  func.func @transform_5(%arg0: i32) -> (i32, i32, i32) {
    %c0_i32 = arith.constant 0 : i32
    %c0_i32_0 = arith.constant 0 : i32
    %c0_i32_1 = arith.constant 0 : i32
    %c0_i32_2 = arith.constant 0 : i32
    return %c0_i32, %c0_i32_0, %c0_i32_1 : i32, i32, i32
  }
  func.func @transform_6(%arg0: i32) -> (i32, i32, i32) {
    %c0_i32 = arith.constant 0 : i32
    %c0_i32_0 = arith.constant 0 : i32
    %c0_i32_1 = arith.constant 0 : i32
    %c0_i32_2 = arith.constant 0 : i32
    return %c0_i32, %c0_i32_0, %c0_i32_1 : i32, i32, i32
  }
  func.func @transform_7(%arg0: i32) -> (i32, i32, i32, i32) {
    %c0_i32 = arith.constant 0 : i32
    %c0_i32_0 = arith.constant 0 : i32
    %c0_i32_1 = arith.constant 0 : i32
    %c0_i32_2 = arith.constant 0 : i32
    %c0_i32_3 = arith.constant 0 : i32
    return %c0_i32, %c0_i32_0, %c0_i32_1, %c0_i32_2 : i32, i32, i32, i32
  }
  func.func @transform_8(%arg0: i32) -> (i32, i32, i32) {
    %c0_i32 = arith.constant 0 : i32
    %c0_i32_0 = arith.constant 0 : i32
    %c0_i32_1 = arith.constant 0 : i32
    %c0_i32_2 = arith.constant 0 : i32
    return %c0_i32, %c0_i32_0, %c0_i32_1 : i32, i32, i32
  }
  func.func @transform_9(%arg0: i32) -> (i32, i32, i32) {
    %c0_i32 = arith.constant 0 : i32
    %c0_i32_0 = arith.constant 0 : i32
    %c0_i32_1 = arith.constant 0 : i32
    %c0_i32_2 = arith.constant 0 : i32
    return %c0_i32, %c0_i32_0, %c0_i32_1 : i32, i32, i32
  }
  func.func @transform_10(%arg0: i32) -> (i32, i32, i32) {
    %c0_i32 = arith.constant 0 : i32
    %c0_i32_0 = arith.constant 0 : i32
    %c0_i32_1 = arith.constant 0 : i32
    %c0_i32_2 = arith.constant 0 : i32
    return %c0_i32, %c0_i32_0, %c0_i32_1 : i32, i32, i32
  }
  func.func @transform_11(%arg0: i32) -> (i32, i32) {
    %c0_i32 = arith.constant 0 : i32
    %c0_i32_0 = arith.constant 0 : i32
    %c0_i32_1 = arith.constant 0 : i32
    return %c0_i32, %c0_i32_0 : i32, i32
  }
  func.func @transform_12(%arg0: i32) -> (i32, i32) {
    %c0_i32 = arith.constant 0 : i32
    %c0_i32_0 = arith.constant 0 : i32
    %c0_i32_1 = arith.constant 0 : i32
    return %c0_i32, %c0_i32_0 : i32, i32
  }
  func.func @transform_13(%arg0: i32) -> (i32, i32) {
    %c0_i32 = arith.constant 0 : i32
    %c0_i32_0 = arith.constant 0 : i32
    %c0_i32_1 = arith.constant 0 : i32
    return %c0_i32, %c0_i32_0 : i32, i32
  }
  func.func @transform_14(%arg0: i32) -> (i32, i32) {
    %c0_i32 = arith.constant 0 : i32
    %c0_i32_0 = arith.constant 0 : i32
    %c0_i32_1 = arith.constant 0 : i32
    return %c0_i32, %c0_i32_0 : i32, i32
  }
  func.func @transform_15(%arg0: i32) -> (i32, i32) {
    %c0_i32 = arith.constant 0 : i32
    %c0_i32_0 = arith.constant 0 : i32
    %c0_i32_1 = arith.constant 0 : i32
    return %c0_i32, %c0_i32_0 : i32, i32
  }
  func.func @transform_16(%arg0: i32) -> (i32, i32) {
    %c0_i32 = arith.constant 0 : i32
    %c0_i32_0 = arith.constant 0 : i32
    %c0_i32_1 = arith.constant 0 : i32
    return %c0_i32, %c0_i32_0 : i32, i32
  }
  func.func @transform_17(%arg0: i32) -> (i32, i32) {
    %c0_i32 = arith.constant 0 : i32
    %c0_i32_0 = arith.constant 0 : i32
    return %arg0, %c0_i32 : i32, i32
  }
}

</mosaic_0001>

<bundles_post_ra>
// kernel: transformer_pose_forward.1
= control target key start
LH: loop header
LB: loop body
LE: loop exit
PB: predicated region body
PF: predicated region fallthrough
CT: control target
= control target key end

     0   :  { %s4220_s24 = smov 0   ;;  %s4895_s0 = inlined_call_operand.vmem [shape: f32[32,48], index: 0, kind: input, shape index: {}]   ;;  %s4896_s1 = inlined_call_operand.vmem [shape: bf16[48,32], index: 1, kind: input, shape index: {}]   ;;  %s4897_s2 = inlined_call_operand.vmem [shape: f32[1,32], index: 2, kind: input, shape index: {}]   ;;  %s4898_s3 = inlined_call_operand.vmem [shape: f32[16,32], index: 3, kind: input, shape index: {}]   ;;  %s4899_s4 = inlined_call_operand.vmem [shape: f32[2,6,32], index: 4, kind: input, shape index: {}]   ;;  %s4900_s5 = inlined_call_operand.vmem [shape: bf16[2,32,96], index: 5, kind: input, shape index: {}]   ;;  %s4901_s6 = inlined_call_operand.vmem [shape: f32[2,1,96], index: 6, kind: input, shape index: {}]   ;;  %s4902_s7 = inlined_call_operand.vmem [shape: bf16[2,4,8,32], index: 7, kind: input, shape index: {}]   ;;  %s4903_s8 = inlined_call_operand.vmem [shape: bf16[2,32,128], index: 8, kind: input, shape index: {}]   ;;  %s4904_s9 = inlined_call_operand.vmem [shape: f32[2,1,128], index: 9, kind: input, shape index: {}]   ;;  %s4905_s10 = inlined_call_operand.vmem [shape: bf16[2,128,32], index: 10, kind: input, shape index: {}]   ;;  %s4906_s11 = inlined_call_operand.vmem [shape: bf16[32,128], index: 11, kind: input, shape index: {}]   ;;  %s4907_s12 = inlined_call_operand.vmem [shape: f32[1,128], index: 12, kind: input, shape index: {}]   ;;  %s4908_s13 = inlined_call_operand.vmem [shape: bf16[32,128], index: 13, kind: input, shape index: {}]   ;;  %s4909_s14 = inlined_call_operand.vmem [shape: f32[1,128], index: 14, kind: input, shape index: {}]   ;;  %s4910_s15 = inlined_call_operand.vmem [shape: bf16[32,14], index: 15, kind: input, shape index: {}]   ;;  %s4911_s16 = inlined_call_operand.vmem [shape: f32[1,14], index: 16, kind: input, shape index: {}]   ;;  %s4912_s17 = inlined_call_operand.vmem [shape: f32[512,14], index: 17, kind: output, shape index: {}]  }
   0x1   :  { %4921 = sst [smem:[#allocation2_spill]] %s4895_s0 }
   0x2   :  { %4922 = sst [smem:[#allocation3_spill]] %s4896_s1 }
   0x3 LB: > { %s4914_s25 = sadd.s32 4294967295, %s4114_s24   ;;  %p3363_p0 = scmp.ge.s32.totalorder %s4114_s24, 1  ;;  %s4114_s24 = sphi %s4220_s24, %s27_s24  }
   0x4   : > { %p488_p1 = scmp.lt.s32.totalorder %s4114_s24, 3 }
   0x6   : > { %p489_p2 = pnand %p3363_p0, %p488_p1 }
   0x7   : > { %s4923_s28 = sld [smem:[#allocation3_spill]] (!%p489_p2)  ;;  %v4116_v1 = vmov (!%p489_p2), 0.0   ;;  %vm4117_vm0 = vmmov (!%p489_p2), 0   ;;  %s3364_s30 = sshll.u32 (!%p489_p2), %s4914_s25, 1  ;;  %vm587_vm1 = vcmask (!%p489_p2), 392192   ;;  %v632_v9 = vld [vmem:[%s4898_s3] sm:$0xff] (!%p489_p2)  ;;  %v665_v35 = vlaneseq (!%p489_p2) }
   0x8   : > { %492 = sbr.rel (%p489_p2) target bundleno = 9150 (0x23be), region = 88  ;;  %3604 = vmatprep.subr.bf16.mxu0 (!%p489_p2), %v4116_v1  ;;  %3622 = vmatprep.subr.bf16.mxu1 (!%p489_p2), %v4116_v1  ;;  %p541_p3 = scmp.lt.s32.totalorder (!%p489_p2), %s3364_s30, 3  ;;  %v3368_v7 = vld [vmem:[%s4897_s2] ss:$0 sm:$0xff] (!%p489_p2)  ;;  %v633_v13 = vld [vmem:[%s4898_s3 + $0x8] sm:$0xff] (!%p489_p2)  ;;  %vm637_vm2 = vcmask (!%p489_p2), 261120  }
   0x9   : > { %3610 = vmatprep.mubr.msk.bf16.mxu0 (!%p489_p2), %vm4117_vm0, %v4116_v1  ;;  %3624 = vmatprep.mubr.msk.bf16.mxu1 (!%p489_p2), %vm4117_vm0, %v4116_v1  ;;  %s4924_s22 = sld [smem:[#allocation2_spill]] (!%p489_p2)  ;;  %v3990_v30 = vld [vmem:[%s4900_s5] sm:$0xff] (!%p489_p2)   ;;  %v3991_v31 = vld [vmem:[%s4900_s5 + $0x8] sm:$0xff] (!%p489_p2)   ;;  %v4282_v39 = vshrl.u32 (!%p489_p2), %v665_v35, 7  ;;  %s4118_s29 = smov (!%p489_p2), 96   ;;  %vm749_vm3 = vcmask (!%p489_p2), 64512  }
   0xa   : > { %v4288_v41 = vld [vmem:[%s4899_s4] sm:$0x3f] (!%p489_p2)  ;;  %s4119_s0 = smov (!%p489_p2), 120   ;;  %vm799_vm4 = vcmask (!%p489_p2), 130048   ;;  %s4121_s18 = smov (!%p489_p2), 112   ;;  %vm1001_vm5 = vcmask (!%p489_p2), 1043456  }
   0xb   : > { %v667_v40 = vsub.s32 (!%p489_p2), 0, %v4282_v39  ;;  %v673_v45 = vsub.s32 (!%p489_p2), 1, %v4282_v39  ;;  %v3373_v54 = vld [vmem:[%s4901_s6] ss:$0 sm:$0xff] (!%p489_p2)  ;;  %s4122_s19 = smov (!%p489_p2), 72   ;;  %s4920_s20 = smov (!%p489_p2), 88  }
   0xc   : > { %s4916_s27 = smov (!%p489_p2), 64   ;;  %s4918_s21 = smov (!%p489_p2), 56   ;;  %vm3270_vm6 = vcmask (!%p489_p2), 113664  }
   0xd   : > { %v3987_v0 = vld [vmem:[%s4923_s28] sm:$0xff] (!%p489_p2)   ;;  %v3988_v2 = vld [vmem:[%s4923_s28 + $0x8] sm:$0xff] (!%p489_p2)   ;;  %v3989_v3 = vld [vmem:[%s4923_s28 + $0x10] sm:$0xff] (!%p489_p2)   ;;  %v668_v43 = vrot.slane (!%p489_p2), %v4288_v41, %v667_v40  ;;  %v674_v49 = vrot.slane (!%p489_p2), %v4288_v41, %v673_v45  ;;  %s4929_s26 = smov (!%p489_p2), 40  }
   0xe   : > { %3605 = vmatpush3.bf16.msra.mxu0 (!%p489_p2), %v3987_v0 }
   0xf   : > { %3606 = vmatprep.subr.bf16.mxu0 %v4116_v1  ;;  %s4932_s30 = smov (!%p541_p3, %s3364_s30), 3 }
  0x10   : > { %s3365_s1 = sshll.u32 %s4932_s30, 3  ;;  %s4120_s30 = smov 104  }
  0x11   : > { %s544_s23 = scalar_lea.vmem %s4924_s22, %s3365_s1  ;;  %s4123_s1 = smov 80  }
  0x12   : > { %3607 = vmatpush3.bf16.msra.mxu0 %v3988_v2  ;;  %v553_v4 = vld [vmem:[%s544_s23] sm:$0xff]  ;;  %v554_v5 = vld [vmem:[%s544_s23 + $0x8] sm:$0xff]  ;;  %s4919_s22 = smov 48   ;;  %s4915_s23 = smov 40  }
  0x13   : > { %3608 = vmatprep.subr.bf16.mxu0 %v4116_v1  ;;  %v555_v6 = vpack.c.bf16 %v554_v5, %v553_v4 }
  0x16   : > { %3609 = vmatpush3.bf16.msra.mxu0 %v3989_v3 }
  0x17   : > { %3614 = vmatprep.subr.bf16.mxu0 %v4116_v1 }
  0x19   : > { %3611 = vmatmul.mubr.msk.bf16.vlgmr.msra.gmra.mrb[0].mxu0 %vm587_vm1, %v555_v6 }
  0x1a   : > { %3618 = vmatprep.mubr.msk.bf16.mxu0 %vm4117_vm0, %v4116_v1  ;;  %3615 = vmatpush3.bf16.msra.mxu0 %v3990_v30 }
  0x1b   : > { %3616 = vmatprep.subr.bf16.mxu0 %v4116_v1 }
  0x1e   : > { %3617 = vmatpush3.bf16.msra.mxu0 %v3991_v31 }
  0x1f   : > { %3628 = vmatprep.subr.bf16.mxu0 %v4116_v1 }
  0xec   : > { %v625_v8 = vpop.f32.mrb[0].mxu0 }
  0xed   : > { %v626_v10 = vadd.f32 %v3368_v7, %v625_v8  ;;  %v3612_v11 = vpop.f32.mrb[1].mxu0 }
  0xee   : > { %v628_v12 = vpop.f32.mrb[2].mxu0 }
  0xef   : > { %v4262_v14 = vadd.f32 %v632_v9, %v626_v10  ;;  %v629_v15 = vadd.f32 %v3368_v7, %v628_v12  ;;  %v3613_v16 = vpop.f32.mrb[3].mxu0 }
  0xf1   : > { %v4264_v17 = vadd.f32 %v633_v13, %v629_v15  ;;  %v638_v18 = vsel %vm637_vm2, %v4262_v14, 0.0 }
  0xf2   : > { %639 = vadd.xlane.f32.xlu0 %v638_v18 }
  0xf3   : > { %v641_v19 = vsel %vm637_vm2, %v4264_v17, 0.0 }
  0xf6   : > { %642 = vadd.xlane.f32.xlu0 %v641_v19 }
 0x17f   : > { %v640_v20 = vpop.xlane.xlu0 %639 }
 0x180   : > { %v645_v21 = vmul.f32 0.03125, %v640_v20 }
 0x182   : > { %v647_v22 = vsub.f32 %v4262_v14, %v645_v21 }
 0x183   : > { %v643_v23 = vpop.xlane.xlu0 %642 }
 0x184   : > { %v646_v24 = vmul.f32 0.03125, %v643_v23  ;;  %v649_v25 = vmul.f32 %v647_v22, %v647_v22 }
 0x186   : > { %v648_v26 = vsub.f32 %v4264_v17, %v646_v24  ;;  %v651_v27 = vsel %vm637_vm2, %v649_v25, 0.0 }
 0x187   : > { %652 = vadd.xlane.f32.xlu1 %v651_v27 }
 0x188   : > { %v650_v28 = vmul.f32 %v648_v26, %v648_v26 }
 0x18a   : > { %v654_v29 = vsel %vm637_vm2, %v650_v28, 0.0 }
 0x18b   : > { %655 = vadd.xlane.f32.xlu1 %v654_v29 }
 0x214   : > { %v653_v32 = vpop.xlane.xlu1 %652 }
 0x215   : > { %v657_v33 = vmul.f32 0.03125, %v653_v32 }
 0x217   : > { %v659_v34 = vadd.f32 1e-05, %v657_v33 }
 0x218   : > { %v656_v36 = vpop.xlane.xlu1 %655 }
 0x219   : > { %4020 = vrsqrt.f32 %v659_v34  ;;  %v658_v37 = vmul.f32 0.03125, %v656_v36 }
 0x21b   : > { %v660_v38 = vadd.f32 1e-05, %v658_v37 }
 0x21d   : > { %4022 = vrsqrt.f32 %v660_v38 }
 0x223   : > { %v4021_v42 = vpop.eup %4020 }
 0x224   : > { %v663_v44 = vmul.f32 %v4021_v42, %v647_v22 }
 0x226   : > { %v669_v47 = vmul.f32 %v668_v43, %v663_v44 }
 0x227   : > { %v4023_v46 = vpop.eup %4022 }
 0x228   : > { %v664_v48 = vmul.f32 %v4023_v46, %v648_v26  ;;  %v675_v51 = vadd.f32 %v674_v49, %v669_v47 }
 0x22a   : > { %v670_v50 = vmul.f32 %v668_v43, %v664_v48 }
 0x22c   : > { %v676_v52 = vadd.f32 %v674_v49, %v670_v50 }
 0x22e   : > { %v677_v53 = vpack.c.bf16 %v676_v52, %v675_v51 }
 0x230   : > { %3619 = vmatmul.mubr.msk.bf16.vlgmr.msra.gmra.mrb[4].mxu0 %vm637_vm2, %v677_v53 }
 0x231   : > { %3630 = vmatprep.mubr.msk.bf16.mxu0 %vm4117_vm0, %v4116_v1 }
 0x303   : > { %v738_v55 = vpop.f32.mrb[4].mxu0 }
 0x304   : > { %v3620_v56 = vpop.f32.mrb[5].mxu0  ;;  %v739_v58 = vadd.f32 %v3373_v54, %v738_v55 }
 0x305   : > { %v741_v57 = vpop.f32.mrb[6].mxu0 }
 0x306   : > { %v742_v59 = vadd.f32 %v3373_v54, %v741_v57  ;;  %v3621_v60 = vpop.f32.mrb[7].mxu0 }
 0x308   : > { %v4303_v61 = vpack.c.bf16 %v742_v59, %v739_v58 }
 0x30a   : > { %874 = vrot.lane.b32.xlu1 %v4303_v61, %s4118_s29  ;;  %747 = vrot.lane.b32.xlu0 %v4303_v61, %s4119_s0 }
 0x30e   : > { %872 = vrot.lane.b32.xlu1 %v4303_v61, %s4120_s30 }
 0x37c   : > { %v748_v62 = vpop.permute.xlu0 %747  ;;  %v875_v0 = vpop.permute.xlu1 %874 }
 0x37d   : > { %v754_v63 = vsel %vm749_vm3, %v748_v62, 0  ;;  %v880_v2 = vsel %vm749_vm3, %v875_v0, 0 }
 0x37e   : > { %3623 = vmatpush3.bf16.xpose.msra.mxu1 %v754_v63  ;;  %v871_v63 = vld [vmem:[%s4902_s7] sm:$0xf] }
 0x37f   : > { %3634 = vmatprep.subr.bf16.mxu1 %v4116_v1  ;;  %v1050_v0 = vsel %vm1001_vm5, %v871_v63, 0  ;;  %v3386_v63 = vld [vmem:[%s4902_s7 + $0x8] sm:$0xf] }
 0x380   : > { %v873_v3 = vpop.permute.xlu1 %872 }
 0x385   : > { %3625 = vmatmul.mubr.msk.bf16.vlgmr.msra.gmra.mrb[0].mxu1 %vm749_vm3, %v4303_v61 }
 0x386   : > { %3635 = vmatpush3.bf16.xpose.msra.mxu1 %v880_v2  ;;  %3636 = vmatprep.mubr.msk.bf16.mxu1 %vm4117_vm0, %v4116_v1  ;;  %v3381_v2 = vld [vmem:[%s4902_s7 + $0x4] sm:$0xf] }
 0x387   : > { %3646 = vmatprep.subr.bf16.mxu1 %v4116_v1 }
 0x38d   : > { %3637 = vmatmul.mubr.msk.bf16.vlgmr.msra.gmra.mrb[4].mxu1 %vm749_vm3, %v873_v3  ;;  %v1003_v3 = vsel %vm1001_vm5, %v3381_v2, 0 }
 0x38e   : > { %3648 = vmatprep.mubr.msk.bf16.mxu1 %vm4117_vm0, %v4116_v1  ;;  %3647 = vmatpush3.bf16.msra.mxu1 %v1003_v3 }
 0x38f   : > { %3658 = vmatprep.subr.bf16.mxu1 %v4116_v1 }
 0x458   : > { %v790_v4 = vpop.f32.mrb[0].mxu1 }
 0x459   : > { %v797_v5 = vmul.f32 0.35355338, %v790_v4  ;;  %v3626_v6 = vpop.f32.mrb[1].mxu1 }
 0x45a   : > { %v793_v7 = vpop.f32.mrb[2].mxu1 }
 0x45b   : > { %v798_v8 = vmul.f32 0.35355338, %v793_v7  ;;  %v3627_v9 = vpop.f32.mrb[3].mxu1  ;;  %v800_v10 = vsel %vm799_vm4, %v797_v5, -inf }
 0x45c   : > { %801 = vmax.xlane.f32.xlu1 %v800_v10 }
 0x45d   : > { %v803_v11 = vsel %vm799_vm4, %v798_v8, -inf }
 0x45e   : > { %804 = vmax.xlane.f32.xlu0 %v803_v11 }
 0x460   : > { %v916_v12 = vpop.f32.mrb[4].mxu1 }
 0x461   : > { %v923_v13 = vmul.f32 0.35355338, %v916_v12  ;;  %v3638_v15 = vpop.f32.mrb[5].mxu1 }
 0x462   : > { %v919_v16 = vpop.f32.mrb[6].mxu1 }
 0x463   : > { %v924_v18 = vmul.f32 0.35355338, %v919_v16  ;;  %v3639_v19 = vpop.f32.mrb[7].mxu1  ;;  %v925_v20 = vsel %vm799_vm4, %v923_v13, -inf }
 0x464   : > { %926 = vmax.xlane.f32.xlu0 %v925_v20 }
 0x465   : > { %v928_v21 = vsel %vm799_vm4, %v924_v18, -inf }
 0x468   : > { %929 = vmax.xlane.f32.xlu0 %v928_v21 }
 0x4e9   : > { %v802_v22 = vpop.xlane.xlu1 %801 }
 0x4ea   : > { %v806_v23 = vsub.f32 %v797_v5, %v802_v22 }
 0x4eb   : > { %v805_v24 = vpop.xlane.xlu0 %804 }
 0x4ec   : > { %v808_v25 = vmul.f32 1.442695, %v806_v23  ;;  %v807_v26 = vsub.f32 %v798_v8, %v805_v24 }
 0x4ee   : > { %4024 = vpow2.f32 %v808_v25  ;;  %v810_v27 = vmul.f32 1.442695, %v807_v26 }
 0x4f0   : > { %4026 = vpow2.f32 %v810_v27 }
 0x4f1   : > { %v927_v28 = vpop.xlane.xlu0 %926 }
 0x4f2   : > { %v931_v29 = vsub.f32 %v923_v13, %v927_v28 }
 0x4f4   : > { %v933_v30 = vmul.f32 1.442695, %v931_v29 }
 0x4f5   : > { %v930_v31 = vpop.xlane.xlu0 %929 }
 0x4f6   : > { %4028 = vpow2.f32 %v933_v30  ;;  %v932_v32 = vsub.f32 %v924_v18, %v930_v31 }
 0x4f8   : > { %v4025_v33 = vpop.eup %4024  ;;  %v935_v34 = vmul.f32 1.442695, %v932_v32 }
 0x4f9   : > { %v812_v35 = vsel %vm799_vm4, %v4025_v33, 0.0 }
 0x4fa   : > { %v4027_v36 = vpop.eup %4026  ;;  %4030 = vpow2.f32 %v935_v34  ;;  %813 = vadd.xlane.f32.xlu1 %v812_v35 }
 0x4fb   : > { %v815_v37 = vsel %vm799_vm4, %v4027_v36, 0.0 }
 0x4fc   : > { %816 = vadd.xlane.f32.xlu0 %v815_v37 }
 0x500   : > { %v4029_v38 = vpop.eup %4028 }
 0x501   : > { %v937_v42 = vsel %vm799_vm4, %v4029_v38, 0.0 }
 0x502   : > { %938 = vadd.xlane.f32.xlu1 %v937_v42 }
 0x504   : > { %v4031_v43 = vpop.eup %4030 }
 0x505   : > { %v940_v44 = vsel %vm799_vm4, %v4031_v43, 0.0 }
 0x506   : > { %941 = vadd.xlane.f32.xlu0 %v940_v44 }
 0x513   : > { %823 = vrot.lane.b32.xlu1 %v4303_v61, %s4121_s18 }
 0x517   : > { %1095 = vrot.lane.b32.xlu1 %v4303_v61, %s4122_s19 }
 0x51b   : > { %1093 = vrot.lane.b32.xlu1 %v4303_v61, %s4123_s1 }
 0x51c   : > { %948 = vrot.lane.b32.xlu0 %v4303_v61, %s4920_s20  ;;  %s4927_s20 = smov 56  }
 0x587   : > { %v814_v46 = vpop.xlane.xlu1 %813 }
 0x588   : > { %4032 = vrcp.f32 %v814_v46 }
 0x589   : > { %v817_v47 = vpop.xlane.xlu0 %816 }
 0x58a   : > { %4034 = vrcp.f32 %v817_v47 }
 0x58f   : > { %v939_v48 = vpop.xlane.xlu1 %938 }
 0x590   : > { %4036 = vrcp.f32 %v939_v48 }
 0x592   : > { %v4033_v49 = vpop.eup %4032 }
 0x593   : > { %v824_v50 = vpop.permute.xlu1 %823  ;;  %v942_v51 = vpop.xlane.xlu0 %941  ;;  %v819_v53 = vmul.f32 %v4033_v49, %v4025_v33 }
 0x594   : > { %v4035_v52 = vpop.eup %4034  ;;  %4038 = vrcp.f32 %v942_v51  ;;  %3629 = vmatpush3.bf16.msra.mxu0 %v824_v50 }
 0x595   : > { %v821_v54 = vmul.f32 %v4035_v52, %v4027_v36  ;;  %3640 = vmatprep.subr.bf16.mxu0 %v4116_v1 }
 0x597   : > { %v949_v55 = vpop.permute.xlu0 %948  ;;  %v822_v56 = vpack.c.bf16 %v821_v54, %v819_v53  ;;  %v1096_v11 = vpop.permute.xlu1 %1095 }
 0x598   : > { %v1101_v16 = vsel %vm749_vm3, %v1096_v11, 0 }
 0x599   : > { %3631 = vmatmul.mubr.msk.bf16.vlgmr.msra.gmra.mrb[8].mxu0 %vm799_vm4, %v822_v56 }
 0x59a   : > { %3641 = vmatpush3.bf16.msra.mxu0 %v949_v55  ;;  %3642 = vmatprep.mubr.msk.bf16.mxu0 %vm4117_vm0, %v4116_v1  ;;  %v4037_v57 = vpop.eup %4036 }
 0x59b   : > { %3652 = vmatprep.subr.bf16.mxu0 %v4116_v1  ;;  %v944_v59 = vmul.f32 %v4037_v57, %v4029_v38  ;;  %v1094_v18 = vpop.permute.xlu1 %1093 }
 0x59e   : > { %v4039_v58 = vpop.eup %4038 }
 0x59f   : > { %v946_v60 = vmul.f32 %v4039_v58, %v4031_v43 }
 0x5a1   : > { %v947_v62 = vpack.c.bf16 %v946_v60, %v944_v59 }
 0x5a3   : > { %3643 = vmatmul.mubr.msk.bf16.vlgmr.msra.gmra.mrb[12].mxu0 %vm799_vm4, %v947_v62 }
 0x5a4   : > { %3654 = vmatprep.mubr.msk.bf16.mxu0 %vm4117_vm0, %v4116_v1  ;;  %3653 = vmatpush3.bf16.msra.mxu0 %v1050_v0  ;;  %v1223_v0 = vsel %vm1001_vm5, %v3386_v63, 0 }
 0x5a5   : > { %3664 = vmatprep.subr.bf16.mxu0 %v4116_v1 }
 0x66c   : > { %v863_v4 = vpop.f32.mrb[8].mxu0 }
 0x66d   : > { %v3632_v5 = vpop.f32.mrb[9].mxu0 }
 0x66e   : > { %v866_v6 = vpop.f32.mrb[10].mxu0 }
 0x66f   : > { %v870_v7 = vpack.c.bf16 %v866_v6, %v863_v4  ;;  %v3633_v8 = vpop.f32.mrb[11].mxu0 }
 0x671   : > { %3655 = vmatmul.mubr.msk.bf16.vlgmr.msra.gmra.mrb[16].mxu0 %vm749_vm3, %v870_v7 }
 0x672   : > { %3666 = vmatprep.mubr.msk.bf16.mxu0 %vm4117_vm0, %v4116_v1 }
 0x676   : > { %v988_v9 = vpop.f32.mrb[12].mxu0 }
 0x677   : > { %v3644_v10 = vpop.f32.mrb[13].mxu0 }
 0x678   : > { %v991_v12 = vpop.f32.mrb[14].mxu0 }
 0x679   : > { %v995_v13 = vpack.c.bf16 %v991_v12, %v988_v9  ;;  %v3645_v15 = vpop.f32.mrb[15].mxu0 }
 0x67b   : > { %3649 = vmatmul.mubr.msk.bf16.vlgmr.msra.gmra.mrb[8].mxu1 %vm749_vm3, %v995_v13 }
 0x67c   : > { %3659 = vmatpush3.bf16.xpose.msra.mxu1 %v1101_v16  ;;  %3660 = vmatprep.mubr.msk.bf16.mxu1 %vm4117_vm0, %v4116_v1 }
 0x67d   : > { %3670 = vmatprep.subr.bf16.mxu1 %v4116_v1 }
 0x683   : > { %3661 = vmatmul.mubr.msk.bf16.vlgmr.msra.gmra.mrb[12].mxu1 %vm749_vm3, %v1094_v18 }
 0x684   : > { %3672 = vmatprep.mubr.msk.bf16.mxu1 %vm4117_vm0, %v4116_v1  ;;  %3671 = vmatpush3.bf16.msra.mxu1 %v1223_v0 }
 0x685   : > { %3682 = vmatprep.subr.bf16.mxu1 %v4116_v1 }
 0x744   : > { %v1086_v19 = vpop.f32.mrb[16].mxu0 }
 0x745   : > { %v3656_v20 = vpop.f32.mrb[17].mxu0 }
 0x746   : > { %v1089_v21 = vpop.f32.mrb[18].mxu0 }
 0x747   : > { %v3657_v22 = vpop.f32.mrb[19].mxu0 }
 0x74e   : > { %v1039_v23 = vpop.f32.mrb[8].mxu1 }
 0x74f   : > { %v4367_v24 = vadd.f32 %v1086_v19, %v1039_v23  ;;  %v3650_v25 = vpop.f32.mrb[9].mxu1 }
 0x750   : > { %v1042_v26 = vpop.f32.mrb[10].mxu1 }
 0x751   : > { %v4369_v27 = vadd.f32 %v1089_v21, %v1042_v26  ;;  %v3651_v28 = vpop.f32.mrb[11].mxu1 }
 0x756   : > { %v1137_v29 = vpop.f32.mrb[12].mxu1 }
 0x757   : > { %v1144_v30 = vmul.f32 0.35355338, %v1137_v29  ;;  %v3662_v31 = vpop.f32.mrb[13].mxu1  ;;  %v3390_v29 = vld [vmem:[%s4902_s7 + $0xc] sm:$0xf] }
 0x758   : > { %v1140_v32 = vpop.f32.mrb[14].mxu1 }
 0x759   : > { %v1145_v33 = vmul.f32 0.35355338, %v1140_v32  ;;  %v3663_v34 = vpop.f32.mrb[15].mxu1  ;;  %v1146_v35 = vsel %vm799_vm4, %v1144_v30, -inf }
 0x75a   : > { %1147 = vmax.xlane.f32.xlu1 %v1146_v35 }
 0x75b   : > { %v1149_v36 = vsel %vm799_vm4, %v1145_v33, -inf }
 0x75c   : > { %1150 = vmax.xlane.f32.xlu0 %v1149_v36 }
 0x76b   : > { %1169 = vrot.lane.b32.xlu1 %v4303_v61, %s4916_s27  ;;  %s4928_s27 = smov 64  }
 0x76f   : > { %1268 = vrot.lane.b32.xlu1 %v4303_v61, %s4918_s21 }
 0x7e7   : > { %v1148_v37 = vpop.xlane.xlu1 %1147 }
 0x7e8   : > { %v1152_v38 = vsub.f32 %v1144_v30, %v1148_v37  ;;  %v1398_v30 = vsel %vm1001_vm5, %v3390_v29, 0 }
 0x7e9   : > { %v1151_v42 = vpop.xlane.xlu0 %1150 }
 0x7ea   : > { %v1154_v43 = vmul.f32 1.442695, %v1152_v38  ;;  %v1153_v44 = vsub.f32 %v1145_v33, %v1151_v42 }
 0x7eb   : > { %v1170_v46 = vpop.permute.xlu1 %1169 }
 0x7ec   : > { %4040 = vpow2.f32 %v1154_v43  ;;  %v1156_v47 = vmul.f32 1.442695, %v1153_v44  ;;  %3665 = vmatpush3.bf16.msra.mxu0 %v1170_v46 }
 0x7ed   : > { %3676 = vmatprep.subr.bf16.mxu0 %v4116_v1 }
 0x7ee   : > { %4042 = vpow2.f32 %v1156_v47 }
 0x7ef   : > { %v1269_v62 = vpop.permute.xlu1 %1268 }
 0x7f6   : > { %v4041_v48 = vpop.eup %4040 }
 0x7f7   : > { %v1158_v49 = vsel %vm799_vm4, %v4041_v48, 0.0 }
 0x7f8   : > { %v4043_v50 = vpop.eup %4042  ;;  %1159 = vadd.xlane.f32.xlu0 %v1158_v49 }
 0x7f9   : > { %v1161_v51 = vsel %vm799_vm4, %v4043_v50, 0.0 }
 0x7fc   : > { %1162 = vadd.xlane.f32.xlu0 %v1161_v51  ;;  %v1447_v51 = vsub.s32 4, %v4282_v39 }
 0x812   : > { %1270 = vrot.lane.b32.xlu0 %v4303_v61, %s4919_s22  ;;  %s4926_s22 = smov 48  }
 0x885   : > { %v1160_v52 = vpop.xlane.xlu0 %1159 }
 0x886   : > { %4044 = vrcp.f32 %v1160_v52 }
 0x889   : > { %v1163_v53 = vpop.xlane.xlu0 %1162 }
 0x88a   : > { %4046 = vrcp.f32 %v1163_v53 }
 0x88d   : > { %v1271_v58 = vpop.permute.xlu0 %1270 }
 0x88e   : > { %v1276_v60 = vsel %vm749_vm3, %v1271_v58, 0 }
 0x890   : > { %v4045_v54 = vpop.eup %4044 }
 0x891   : > { %v1165_v56 = vmul.f32 %v4045_v54, %v4041_v48  ;;  %v1448_v54 = vrot.slane %v4288_v41, %v1447_v51 }
 0x894   : > { %v4047_v55 = vpop.eup %4046 }
 0x895   : > { %v1167_v57 = vmul.f32 %v4047_v55, %v4043_v50 }
 0x897   : > { %v1168_v59 = vpack.c.bf16 %v1167_v57, %v1165_v56 }
 0x899   : > { %3667 = vmatmul.mubr.msk.bf16.vlgmr.msra.gmra.mrb[20].mxu0 %vm799_vm4, %v1168_v59 }
 0x89a   : > { %3677 = vmatpush3.bf16.xpose.msra.mxu0 %v1276_v60  ;;  %3678 = vmatprep.mubr.msk.bf16.mxu0 %vm4117_vm0, %v4116_v1 }
 0x89b   : > { %3688 = vmatprep.subr.bf16.mxu0 %v4116_v1 }
 0x8a1   : > { %3679 = vmatmul.mubr.msk.bf16.vlgmr.msra.gmra.mrb[24].mxu0 %vm749_vm3, %v1269_v62 }
 0x8a2   : > { %3690 = vmatprep.mubr.msk.bf16.mxu0 %vm4117_vm0, %v4116_v1  ;;  %3689 = vmatpush3.bf16.msra.mxu0 %v1398_v30 }
 0x8a3   : > { %3702 = vmatprep.subr.bf16.mxu0 %v4116_v1 }
 0x96c   : > { %v1209_v2 = vpop.f32.mrb[20].mxu0 }
 0x96d   : > { %v3668_v3 = vpop.f32.mrb[21].mxu0 }
 0x96e   : > { %v1212_v4 = vpop.f32.mrb[22].mxu0 }
 0x96f   : > { %v1216_v5 = vpack.c.bf16 %v1212_v4, %v1209_v2  ;;  %v3669_v6 = vpop.f32.mrb[23].mxu0 }
 0x971   : > { %3673 = vmatmul.mubr.msk.bf16.vlgmr.msra.gmra.mrb[16].mxu1 %vm749_vm3, %v1216_v5 }
 0x972   : > { %3684 = vmatprep.mubr.msk.bf16.mxu1 %vm4117_vm0, %v4116_v1 }
 0x974   : > { %v1312_v7 = vpop.f32.mrb[24].mxu0 }
 0x975   : > { %v1319_v8 = vmul.f32 0.35355338, %v1312_v7  ;;  %v3680_v9 = vpop.f32.mrb[25].mxu0 }
 0x976   : > { %v1315_v10 = vpop.f32.mrb[26].mxu0 }
 0x977   : > { %v1320_v11 = vmul.f32 0.35355338, %v1315_v10  ;;  %v3681_v12 = vpop.f32.mrb[27].mxu0  ;;  %v1321_v13 = vsel %vm799_vm4, %v1319_v8, -inf }
 0x978   : > { %1322 = vmax.xlane.f32.xlu1 %v1321_v13  ;;  %v3993_v12 = vld [vmem:[%s4903_s8 + $0x8] sm:$0xff]  }
 0x979   : > { %v1324_v15 = vsel %vm799_vm4, %v1320_v11, -inf }
 0x97a   : > { %1325 = vmax.xlane.f32.xlu0 %v1324_v15 }
 0xa05   : > { %v1323_v16 = vpop.xlane.xlu1 %1322 }
 0xa06   : > { %v1327_v18 = vsub.f32 %v1319_v8, %v1323_v16 }
 0xa07   : > { %v1326_v19 = vpop.xlane.xlu0 %1325 }
 0xa08   : > { %v1329_v20 = vmul.f32 1.442695, %v1327_v18  ;;  %v1328_v21 = vsub.f32 %v1320_v11, %v1326_v19  ;;  %v3992_v11 = vld [vmem:[%s4903_s8] sm:$0xff]  }
 0xa0a   : > { %4048 = vpow2.f32 %v1329_v20  ;;  %v1331_v22 = vmul.f32 1.442695, %v1328_v21  ;;  %v1479_v21 = vsub.s32 2, %v4282_v39 }
 0xa0c   : > { %4050 = vpow2.f32 %v1331_v22 }
 0xa14   : > { %v4049_v23 = vpop.eup %4048 }
 0xa15   : > { %v1333_v25 = vsel %vm799_vm4, %v4049_v23, 0.0 }
 0xa16   : > { %v4051_v26 = vpop.eup %4050  ;;  %1334 = vadd.xlane.f32.xlu0 %v1333_v25 }
 0xa17   : > { %v1336_v28 = vsel %vm799_vm4, %v4051_v26, 0.0 }
 0xa18   : > { %1337 = vadd.xlane.f32.xlu1 %v1336_v28 }
 0xa2c   : > { %1344 = vrot.lane.b32.xlu0 %v4303_v61, %s4915_s23 }
 0xa44   : > { %v1259_v31 = vpop.f32.mrb[16].mxu1 }
 0xa45   : > { %v1266_v32 = vadd.f32 %v1259_v31, %v4367_v24  ;;  %v3674_v33 = vpop.f32.mrb[17].mxu1 }
 0xa46   : > { %v1262_v34 = vpop.f32.mrb[18].mxu1 }
 0xa47   : > { %v1267_v35 = vadd.f32 %v1262_v34, %v4369_v27  ;;  %v3675_v36 = vpop.f32.mrb[19].mxu1 }
 0xa48   : > { %v3994_v36 = vld [vmem:[%s4905_s10] sm:$0xff]  }
 0xaa3   : > { %v1335_v37 = vpop.xlane.xlu0 %1334 }
 0xaa4   : > { %4052 = vrcp.f32 %v1335_v37  ;;  %v3995_v37 = vld [vmem:[%s4905_s10 + $0x8] sm:$0xff]  }
 0xaa5   : > { %v1338_v61 = vpop.xlane.xlu1 %1337 }
 0xaa6   : > { %4054 = vrcp.f32 %v1338_v61  ;;  %v3996_v61 = vld [vmem:[%s4905_s10 + $0x10] sm:$0xff]  }
 0xaa7   : > { %v1345_v38 = vpop.permute.xlu0 %1344 }
 0xaa8   : > { %3683 = vmatpush3.bf16.msra.mxu1 %v1345_v38  ;;  %v3997_v38 = vld [vmem:[%s4905_s10 + $0x18] sm:$0xff]  }
 0xaa9   : > { %3694 = vmatprep.subr.bf16.mxu1 %v4116_v1 }
 0xaae   : > { %v4053_v42 = vpop.eup %4052 }
 0xaaf   : > { %v1340_v44 = vmul.f32 %v4053_v42, %v4049_v23  ;;  %v1480_v23 = vrot.slane %v4288_v41, %v1479_v21  ;;  %v3998_v42 = vld [vmem:[%s4905_s10 + $0x20] sm:$0xff]  }
 0xab0   : > { %v4055_v43 = vpop.eup %4054 }
 0xab1   : > { %v1342_v46 = vmul.f32 %v4055_v43, %v4051_v26  ;;  %v1485_v26 = vsub.s32 3, %v4282_v39  ;;  %v3999_v43 = vld [vmem:[%s4905_s10 + $0x28] sm:$0xff]  }
 0xab3   : > { %v1343_v47 = vpack.c.bf16 %v1342_v46, %v1340_v44  ;;  %v1486_v31 = vrot.slane %v4288_v41, %v1485_v26  ;;  %v4000_v44 = vld [vmem:[%s4905_s10 + $0x30] sm:$0xff]   ;;  %v4001_v46 = vld [vmem:[%s4905_s10 + $0x38] sm:$0xff]  }
 0xab5   : > { %3685 = vmatmul.mubr.msk.bf16.vlgmr.msra.gmra.mrb[20].mxu1 %vm799_vm4, %v1343_v47  ;;  %v3392_v47 = vld [vmem:[%s4904_s9] ss:$0 sm:$0xff] }
 0xab6   : > { %3698 = vmatprep.mubr.msk.bf16.mxu1 %vm4117_vm0, %v4116_v1  ;;  %3695 = vmatpush3.bf16.msra.mxu1 %v3992_v11 }
 0xab7   : > { %3696 = vmatprep.subr.bf16.mxu1 %v4116_v1 }
 0xaba   : > { %3697 = vmatpush3.bf16.msra.mxu1 %v3993_v12 }
 0xabb   : > { %3722 = vmatprep.subr.bf16.mxu1 %v4116_v1 }
 0xb88   : > { %v1384_v24 = vpop.f32.mrb[20].mxu1 }
 0xb89   : > { %v3686_v27 = vpop.f32.mrb[21].mxu1 }
 0xb8a   : > { %v1387_v48 = vpop.f32.mrb[22].mxu1 }
 0xb8b   : > { %v1391_v49 = vpack.c.bf16 %v1387_v48, %v1384_v24  ;;  %v3687_v50 = vpop.f32.mrb[23].mxu1 }
 0xb8d   : > { %3691 = vmatmul.mubr.msk.bf16.vlgmr.msra.gmra.mrb[28].mxu0 %vm749_vm3, %v1391_v49 }
 0xb8e   : > { %3718 = vmatprep.mubr.msk.bf16.mxu0 %vm4117_vm0, %v4116_v1  ;;  %3703 = vmatpush3.bf16.msra.mxu0 %v3994_v36  ;;  %v4003_v36 = vld [vmem:[%s4900_s5 + $0x18] sm:$0xff]  }
 0xb8f   : > { %3704 = vmatprep.subr.bf16.mxu0 %v4116_v1 }
 0xb92   : > { %3705 = vmatpush3.bf16.msra.mxu0 %v3995_v37 }
 0xb93   : > { %3706 = vmatprep.subr.bf16.mxu0 %v4116_v1 }
 0xb96   : > { %3707 = vmatpush3.bf16.msra.mxu0 %v3996_v61 }
 0xb97   : > { %3708 = vmatprep.subr.bf16.mxu0 %v4116_v1 }
 0xb9a   : > { %3709 = vmatpush3.bf16.msra.mxu0 %v3997_v38 }
 0xb9b   : > { %3710 = vmatprep.subr.bf16.mxu0 %v4116_v1 }
 0xb9e   : > { %3711 = vmatpush3.bf16.msra.mxu0 %v3998_v42 }
 0xb9f   : > { %3712 = vmatprep.subr.bf16.mxu0 %v4116_v1 }
 0xba2   : > { %3713 = vmatpush3.bf16.msra.mxu0 %v3999_v43 }
 0xba3   : > { %3714 = vmatprep.subr.bf16.mxu0 %v4116_v1 }
 0xba6   : > { %3715 = vmatpush3.bf16.msra.mxu0 %v4000_v44 }
 0xba7   : > { %3716 = vmatprep.subr.bf16.mxu0 %v4116_v1 }
 0xbaa   : > { %3717 = vmatpush3.bf16.msra.mxu0 %v4001_v46  ;;  %v4521_v46 = vld [vmem:[%s4899_s4 + $0x8] sm:$0x3f] }
 0xbab   : > { %3748 = vmatprep.subr.bf16.mxu0 %v4116_v1 }
 0xc60   : > { %v1434_v52 = vpop.f32.mrb[28].mxu0 }
 0xc61   : > { %v1441_v53 = vadd.f32 %v1434_v52, %v1266_v32  ;;  %v3692_v55 = vpop.f32.mrb[29].mxu0 }
 0xc62   : > { %v1437_v56 = vpop.f32.mrb[30].mxu0 }
 0xc63   : > { %v1443_v57 = vadd.f32 %v1441_v53, %v4262_v14  ;;  %v1442_v58 = vadd.f32 %v1437_v56, %v1267_v35  ;;  %v3693_v59 = vpop.f32.mrb[31].mxu0 }
 0xc65   : > { %v4423_v60 = vadd.f32 %v1448_v54, %v1443_v57  ;;  %v1444_v62 = vadd.f32 %v1442_v58, %v4264_v17 }
 0xc67   : > { %v4426_v63 = vadd.f32 %v1448_v54, %v1444_v62  ;;  %v1451_v0 = vsel %vm637_vm2, %v4423_v60, 0.0 }
 0xc68   : > { %1452 = vadd.xlane.f32.xlu1 %v1451_v0 }
 0xc69   : > { %v1454_v2 = vsel %vm637_vm2, %v4426_v63, 0.0 }
 0xc6c   : > { %1455 = vadd.xlane.f32.xlu1 %v1454_v2 }
 0xcf5   : > { %v1453_v3 = vpop.xlane.xlu1 %1452 }
 0xcf6   : > { %v1457_v4 = vmul.f32 0.03125, %v1453_v3 }
 0xcf8   : > { %v1459_v14 = vsub.f32 %v4423_v60, %v1457_v4 }
 0xcf9   : > { %v1456_v5 = vpop.xlane.xlu1 %1455 }
 0xcfa   : > { %v1458_v6 = vmul.f32 0.03125, %v1456_v5  ;;  %v1461_v7 = vmul.f32 %v1459_v14, %v1459_v14 }
 0xcfc   : > { %v1460_v8 = vsub.f32 %v4426_v63, %v1458_v6  ;;  %v1463_v17 = vsel %vm637_vm2, %v1461_v7, 0.0 }
 0xcfd   : > { %1464 = vadd.xlane.f32.xlu1 %v1463_v17 }
 0xcfe   : > { %v1462_v9 = vmul.f32 %v1460_v8, %v1460_v8 }
 0xd00   : > { %v1466_v10 = vsel %vm637_vm2, %v1462_v9, 0.0 }
 0xd01   : > { %1467 = vadd.xlane.f32.xlu1 %v1466_v10  ;;  %v1594_v10 = vsub.s32 5, %v4282_v39  ;;  %v4017_v39 = vld [vmem:[%s4908_s13 + $0x8] sm:$0xff]  }
 0xd03   : > { %v1595_v11 = vrot.slane %v4288_v41, %v1594_v10 }
 0xd8a   : > { %v1465_v13 = vpop.xlane.xlu1 %1464 }
 0xd8b   : > { %v1469_v15 = vmul.f32 0.03125, %v1465_v13 }
 0xd8d   : > { %v1471_v16 = vadd.f32 1e-05, %v1469_v15 }
 0xd8e   : > { %v1468_v18 = vpop.xlane.xlu1 %1467 }
 0xd8f   : > { %4056 = vrsqrt.f32 %v1471_v16  ;;  %v1470_v19 = vmul.f32 0.03125, %v1468_v18 }
 0xd91   : > { %v1472_v20 = vadd.f32 1e-05, %v1470_v19 }
 0xd93   : > { %4058 = vrsqrt.f32 %v1472_v20 }
 0xd99   : > { %v4057_v22 = vpop.eup %4056 }
 0xd9a   : > { %v1475_v25 = vmul.f32 %v4057_v22, %v1459_v14 }
 0xd9c   : > { %v1481_v29 = vmul.f32 %v1480_v23, %v1475_v25 }
 0xd9d   : > { %v4059_v28 = vpop.eup %4058 }
 0xd9e   : > { %v1476_v30 = vmul.f32 %v4059_v28, %v1460_v8  ;;  %v1487_v33 = vadd.f32 %v1486_v31, %v1481_v29 }
 0xda0   : > { %v1482_v32 = vmul.f32 %v1480_v23, %v1476_v30 }
 0xda2   : > { %v1488_v34 = vadd.f32 %v1486_v31, %v1482_v32 }
 0xda4   : > { %v1489_v35 = vpack.c.bf16 %v1488_v34, %v1487_v33 }
 0xda6   : > { %3699 = vmatmul.mubr.msk.bf16.vlgmr.msra.gmra.mrb[24].mxu1 %vm637_vm2, %v1489_v35  ;;  %v4002_v35 = vld [vmem:[%s4900_s5 + $0x10] sm:$0xff]  }
 0xda7   : > { %3726 = vmatprep.mubr.msk.bf16.mxu1 %vm4117_vm0, %v4116_v1  ;;  %3723 = vmatpush3.bf16.msra.mxu1 %v4002_v35 }
 0xda8   : > { %3724 = vmatprep.subr.bf16.mxu1 %v4116_v1 }
 0xdab   : > { %3725 = vmatpush3.bf16.msra.mxu1 %v4003_v36 }
 0xdac   : > { %3730 = vmatprep.subr.bf16.mxu1 %v4116_v1 }
 0xe79   : > { %v1550_v24 = vpop.f32.mrb[24].mxu1 }
 0xe7a   : > { %v1551_v27 = vadd.f32 %v3392_v47, %v1550_v24  ;;  %v3700_v48 = vpop.f32.mrb[25].mxu1  ;;  %v1718_v24 = vrot.slane %v4521_v46, %v667_v40  ;;  %v3410_v40 = vld [vmem:[%s4901_s6 + $0x1] ss:$0 sm:$0xff] }
 0xe7b   : > { %v1553_v49 = vpop.f32.mrb[26].mxu1 }
 0xe7c   : > { %v1557_v50 = vmul.f32 %v1551_v27, %v1551_v27  ;;  %v1554_v52 = vadd.f32 %v3392_v47, %v1553_v49  ;;  %v3701_v53 = vpop.f32.mrb[27].mxu1 }
 0xe7e   : > { %v1559_v54 = vmul.f32 %v1557_v50, %v1551_v27  ;;  %v1558_v55 = vmul.f32 %v1554_v52, %v1554_v52 }
 0xe80   : > { %v1561_v56 = vmul.f32 0.044715, %v1559_v54  ;;  %v1560_v57 = vmul.f32 %v1558_v55, %v1554_v52 }
 0xe82   : > { %v1563_v58 = vadd.f32 %v1561_v56, %v1551_v27  ;;  %v1562_v59 = vmul.f32 0.044715, %v1560_v57 }
 0xe84   : > { %v1565_v62 = vmul.f32 0.7978846, %v1563_v58  ;;  %v1564_v0 = vadd.f32 %v1562_v59, %v1554_v52 }
 0xe86   : > { %4060 = vtanh.f32 %v1565_v62  ;;  %v1566_v2 = vmul.f32 0.7978846, %v1564_v0 }
 0xe88   : > { %4062 = vtanh.f32 %v1566_v2 }
 0xe90   : > { %v4061_v3 = vpop.eup %4060 }
 0xe91   : > { %v1569_v4 = vadd.f32 1.0, %v4061_v3 }
 0xe92   : > { %v4063_v14 = vpop.eup %4062 }
 0xe93   : > { %v1571_v5 = vmul.f32 0.5, %v1569_v4  ;;  %v1570_v6 = vadd.f32 1.0, %v4063_v14 }
 0xe95   : > { %v1572_v7 = vmul.f32 0.5, %v1570_v6  ;;  %v1573_v8 = vmul.f32 %v1571_v5, %v1551_v27 }
 0xe97   : > { %v1574_v17 = vmul.f32 %v1572_v7, %v1554_v52  ;;  %v1724_v52 = vrot.slane %v4521_v46, %v673_v45 }
 0xe99   : > { %v1575_v9 = vpack.c.bf16 %v1574_v17, %v1573_v8 }
 0xe9b   : > { %3719 = vmatmul.mubr.bf16.vlgmr.msra.gmra.mrb[32].mxu0 %v1575_v9 }
 0xe9c   : > { %3750 = vmatprep.mubr.msk.bf16.mxu0 %vm4117_vm0, %v4116_v1 }
 0xf6e   : > { %v1678_v12 = vpop.f32.mrb[32].mxu0 }
 0xf6f   : > { %v1679_v13 = vadd.f32 %v1678_v12, %v1595_v11  ;;  %v3720_v15 = vpop.f32.mrb[33].mxu0 }
 0xf70   : > { %v1681_v16 = vpop.f32.mrb[34].mxu0 }
 0xf71   : > { %v4497_v18 = vadd.f32 %v1679_v13, %v4423_v60  ;;  %v1682_v19 = vadd.f32 %v1681_v16, %v1595_v11  ;;  %v3721_v20 = vpop.f32.mrb[35].mxu0 }
 0xf73   : > { %v4500_v22 = vadd.f32 %v1682_v19, %v4426_v63  ;;  %v1689_v23 = vsel %vm637_vm2, %v4497_v18, 0.0 }
 0xf74   : > { %1690 = vadd.xlane.f32.xlu1 %v1689_v23 }
 0xf75   : > { %v1692_v25 = vsel %vm637_vm2, %v4500_v22, 0.0 }
 0xf78   : > { %1693 = vadd.xlane.f32.xlu1 %v1692_v25 }
0x1001   : > { %v1691_v41 = vpop.xlane.xlu1 %1690 }
0x1002   : > { %v1695_v28 = vmul.f32 0.03125, %v1691_v41 }
0x1004   : > { %v1697_v29 = vsub.f32 %v4497_v18, %v1695_v28 }
0x1005   : > { %v1694_v30 = vpop.xlane.xlu1 %1693 }
0x1006   : > { %v1696_v60 = vmul.f32 0.03125, %v1694_v30  ;;  %v1699_v31 = vmul.f32 %v1697_v29, %v1697_v29 }
0x1008   : > { %v1698_v32 = vsub.f32 %v4500_v22, %v1696_v60  ;;  %v1701_v63 = vsel %vm637_vm2, %v1699_v31, 0.0 }
0x1009   : > { %1702 = vadd.xlane.f32.xlu0 %v1701_v63 }
0x100a   : > { %v1700_v33 = vmul.f32 %v1698_v32, %v1698_v32 }
0x100c   : > { %v1704_v34 = vsel %vm637_vm2, %v1700_v33, 0.0 }
0x100d   : > { %1705 = vadd.xlane.f32.xlu1 %v1704_v34 }
0x1096   : > { %v1703_v37 = vpop.xlane.xlu0 %1702 }
0x1097   : > { %v1707_v61 = vmul.f32 0.03125, %v1703_v37 }
0x1099   : > { %v1709_v38 = vadd.f32 1e-05, %v1707_v61 }
0x109a   : > { %v1706_v42 = vpop.xlane.xlu1 %1705 }
0x109b   : > { %4064 = vrsqrt.f32 %v1709_v38  ;;  %v1708_v43 = vmul.f32 0.03125, %v1706_v42 }
0x109d   : > { %v1710_v44 = vadd.f32 1e-05, %v1708_v43 }
0x109f   : > { %4066 = vrsqrt.f32 %v1710_v44 }
0x10a5   : > { %v4065_v47 = vpop.eup %4064 }
0x10a6   : > { %v1713_v27 = vmul.f32 %v4065_v47, %v1697_v29 }
0x10a8   : > { %v1719_v49 = vmul.f32 %v1718_v24, %v1713_v27 }
0x10a9   : > { %v4067_v48 = vpop.eup %4066 }
0x10aa   : > { %v1714_v50 = vmul.f32 %v4067_v48, %v1698_v32  ;;  %v1725_v54 = vadd.f32 %v1724_v52, %v1719_v49 }
0x10ac   : > { %v1720_v53 = vmul.f32 %v1718_v24, %v1714_v50 }
0x10ae   : > { %v1726_v55 = vadd.f32 %v1724_v52, %v1720_v53 }
0x10b0   : > { %v1727_v56 = vpack.c.bf16 %v1726_v55, %v1725_v54 }
0x10b2   : > { %3727 = vmatmul.mubr.msk.bf16.vlgmr.msra.gmra.mrb[28].mxu1 %vm637_vm2, %v1727_v56 }
0x10b3   : > { %3732 = vmatprep.mubr.msk.bf16.mxu1 %vm4117_vm0, %v4116_v1 }
0x1185   : > { %v1790_v57 = vpop.f32.mrb[28].mxu1 }
0x1186   : > { %v3728_v58 = vpop.f32.mrb[29].mxu1  ;;  %v1791_v62 = vadd.f32 %v3410_v40, %v1790_v57 }
0x1187   : > { %v1793_v59 = vpop.f32.mrb[30].mxu1 }
0x1188   : > { %v1794_v0 = vadd.f32 %v3410_v40, %v1793_v59  ;;  %v3729_v2 = vpop.f32.mrb[31].mxu1 }
0x118a   : > { %v4535_v45 = vpack.c.bf16 %v1794_v0, %v1791_v62 }
0x118c   : > { %1799 = vrot.lane.b32.xlu1 %v4535_v45, %s4119_s0  ;;  %s4925_s0 = smov 88  }
0x11fe   : > { %v1800_v3 = vpop.permute.xlu1 %1799 }
0x11ff   : > { %v1805_v4 = vsel %vm749_vm3, %v1800_v3, 0  ;;  %v3419_v3 = vld [vmem:[%s4902_s7 + $0x14] sm:$0xf] }
0x1200   : > { %3731 = vmatpush3.bf16.xpose.msra.mxu1 %v1805_v4  ;;  %v2053_v4 = vsel %vm1001_vm5, %v3419_v3, 0 }
0x1201   : > { %3736 = vmatprep.subr.bf16.mxu1 %v4116_v1 }
0x1207   : > { %3733 = vmatmul.mubr.msk.bf16.vlgmr.msra.gmra.mrb[32].mxu1 %vm749_vm3, %v4535_v45 }
0x1208   : > { %3738 = vmatprep.mubr.msk.bf16.mxu1 %vm4117_vm0, %v4116_v1 }
0x12da   : > { %v1841_v14 = vpop.f32.mrb[32].mxu1 }
0x12db   : > { %v1848_v5 = vmul.f32 0.35355338, %v1841_v14  ;;  %v3734_v6 = vpop.f32.mrb[33].mxu1 }
0x12dc   : > { %v1844_v7 = vpop.f32.mrb[34].mxu1 }
0x12dd   : > { %v1849_v8 = vmul.f32 0.35355338, %v1844_v7  ;;  %v3735_v17 = vpop.f32.mrb[35].mxu1  ;;  %v1850_v9 = vsel %vm799_vm4, %v1848_v5, -inf }
0x12de   : > { %1851 = vmax.xlane.f32.xlu1 %v1850_v9  ;;  %v3416_v17 = vld [vmem:[%s4902_s7 + $0x10] sm:$0xf] }
0x12df   : > { %v1853_v11 = vsel %vm799_vm4, %v1849_v8, -inf }
0x12e0   : > { %1854 = vmax.xlane.f32.xlu0 %v1853_v11 }
0x12ef   : > { %1925 = vrot.lane.b32.xlu1 %v4535_v45, %s4118_s29 }
0x136b   : > { %v1852_v12 = vpop.xlane.xlu1 %1851 }
0x136c   : > { %v1856_v13 = vsub.f32 %v1848_v5, %v1852_v12 }
0x136d   : > { %v1855_v15 = vpop.xlane.xlu0 %1854 }
0x136e   : > { %v1858_v16 = vmul.f32 1.442695, %v1856_v13  ;;  %v1857_v19 = vsub.f32 %v1849_v8, %v1855_v15  ;;  %v2100_v13 = vsel %vm1001_vm5, %v3416_v17, 0 }
0x136f   : > { %v1926_v34 = vpop.permute.xlu1 %1925 }
0x1370   : > { %4068 = vpow2.f32 %v1858_v16  ;;  %v1860_v20 = vmul.f32 1.442695, %v1857_v19  ;;  %v1931_v36 = vsel %vm749_vm3, %v1926_v34, 0 }
0x1372   : > { %4070 = vpow2.f32 %v1860_v20 }
0x137a   : > { %v4069_v23 = vpop.eup %4068 }
0x137b   : > { %v1862_v25 = vsel %vm799_vm4, %v4069_v23, 0.0 }
0x137c   : > { %v4071_v41 = vpop.eup %4070  ;;  %1863 = vadd.xlane.f32.xlu0 %v1862_v25 }
0x137d   : > { %v1865_v28 = vsel %vm799_vm4, %v4071_v41, 0.0 }
0x1380   : > { %1866 = vadd.xlane.f32.xlu0 %v1865_v28 }
0x1396   : > { %1873 = vrot.lane.b32.xlu0 %v4535_v45, %s4121_s18 }
0x139a   : > { %1923 = vrot.lane.b32.xlu0 %v4535_v45, %s4120_s30 }
0x1409   : > { %v1864_v29 = vpop.xlane.xlu0 %1863 }
0x140a   : > { %4072 = vrcp.f32 %v1864_v29 }
0x140d   : > { %v1867_v30 = vpop.xlane.xlu0 %1866 }
0x140e   : > { %4074 = vrcp.f32 %v1867_v30 }
0x1411   : > { %v1874_v60 = vpop.permute.xlu0 %1873 }
0x1412   : > { %3737 = vmatpush3.bf16.msra.mxu1 %v1874_v60 }
0x1413   : > { %3742 = vmatprep.subr.bf16.mxu1 %v4116_v1 }
0x1414   : > { %v4073_v31 = vpop.eup %4072 }
0x1415   : > { %v1869_v63 = vmul.f32 %v4073_v31, %v4069_v23  ;;  %v1924_v37 = vpop.permute.xlu0 %1923 }
0x1418   : > { %v4075_v32 = vpop.eup %4074 }
0x1419   : > { %v1871_v33 = vmul.f32 %v4075_v32, %v4071_v41 }
0x141b   : > { %v1872_v35 = vpack.c.bf16 %v1871_v33, %v1869_v63 }
0x141d   : > { %3739 = vmatmul.mubr.msk.bf16.vlgmr.msra.gmra.mrb[36].mxu1 %vm799_vm4, %v1872_v35 }
0x141e   : > { %3743 = vmatpush3.bf16.xpose.msra.mxu1 %v1931_v36  ;;  %3744 = vmatprep.mubr.msk.bf16.mxu1 %vm4117_vm0, %v4116_v1 }
0x141f   : > { %3754 = vmatprep.subr.bf16.mxu1 %v4116_v1 }
0x1425   : > { %3745 = vmatmul.mubr.msk.bf16.vlgmr.msra.gmra.mrb[40].mxu1 %vm749_vm3, %v1924_v37 }
0x1426   : > { %3756 = vmatprep.mubr.msk.bf16.mxu1 %vm4117_vm0, %v4116_v1  ;;  %3755 = vmatpush3.bf16.msra.mxu1 %v2053_v4 }
0x1427   : > { %3766 = vmatprep.subr.bf16.mxu1 %v4116_v1 }
0x14f0   : > { %v1913_v61 = vpop.f32.mrb[36].mxu1 }
0x14f1   : > { %v3740_v38 = vpop.f32.mrb[37].mxu1 }
0x14f2   : > { %v1916_v42 = vpop.f32.mrb[38].mxu1 }
0x14f3   : > { %v1920_v43 = vpack.c.bf16 %v1916_v42, %v1913_v61  ;;  %v3741_v44 = vpop.f32.mrb[39].mxu1 }
0x14f8   : > { %v1967_v47 = vpop.f32.mrb[40].mxu1 }
0x14f9   : > { %v1974_v24 = vmul.f32 0.35355338, %v1967_v47  ;;  %v3746_v27 = vpop.f32.mrb[41].mxu1 }
0x14fa   : > { %v1970_v48 = vpop.f32.mrb[42].mxu1 }
0x14fb   : > { %v1975_v49 = vmul.f32 0.35355338, %v1970_v48  ;;  %v3747_v50 = vpop.f32.mrb[43].mxu1  ;;  %v1976_v52 = vsel %vm799_vm4, %v1974_v24, -inf }
0x14fc   : > { %1977 = vmax.xlane.f32.xlu0 %v1976_v52 }
0x14fd   : > { %v1979_v53 = vsel %vm799_vm4, %v1975_v49, -inf }
0x14fe   : > { %1980 = vmax.xlane.f32.xlu1 %v1979_v53 }
0x150f   : > { %2145 = vrot.lane.b32.xlu1 %v4535_v45, %s4122_s19 }
0x1513   : > { %2143 = vrot.lane.b32.xlu1 %v4535_v45, %s4123_s1 }
0x1589   : > { %v1978_v54 = vpop.xlane.xlu0 %1977 }
0x158a   : > { %v1982_v55 = vsub.f32 %v1974_v24, %v1978_v54 }
0x158b   : > { %v1981_v56 = vpop.xlane.xlu1 %1980 }
0x158c   : > { %v1984_v40 = vmul.f32 1.442695, %v1982_v55  ;;  %v1983_v57 = vsub.f32 %v1975_v49, %v1981_v56 }
0x158e   : > { %4076 = vpow2.f32 %v1984_v40  ;;  %v1986_v58 = vmul.f32 1.442695, %v1983_v57 }
0x158f   : > { %v2146_v19 = vpop.permute.xlu1 %2145 }
0x1590   : > { %4078 = vpow2.f32 %v1986_v58  ;;  %v2151_v41 = vsel %vm749_vm3, %v2146_v19, 0 }
0x1593   : > { %v2144_v31 = vpop.permute.xlu1 %2143 }
0x1598   : > { %v4077_v59 = vpop.eup %4076 }
0x1599   : > { %v1988_v62 = vsel %vm799_vm4, %v4077_v59, 0.0 }
0x159a   : > { %v4079_v0 = vpop.eup %4078  ;;  %1989 = vadd.xlane.f32.xlu0 %v1988_v62 }
0x159b   : > { %v1991_v2 = vsel %vm799_vm4, %v4079_v0, 0.0 }
0x159e   : > { %1992 = vadd.xlane.f32.xlu0 %v1991_v2 }
0x15b4   : > { %1999 = vrot.lane.b32.xlu0 %v4535_v45, %s4925_s0  ;;  %s4129_s0 = smov 32  }
0x1627   : > { %v1990_v14 = vpop.xlane.xlu0 %1989 }
0x1628   : > { %4080 = vrcp.f32 %v1990_v14 }
0x162b   : > { %v1993_v5 = vpop.xlane.xlu0 %1992 }
0x162c   : > { %4082 = vrcp.f32 %v1993_v5 }
0x162f   : > { %v2000_v6 = vpop.permute.xlu0 %1999 }
0x1630   : > { %3749 = vmatpush3.bf16.msra.mxu0 %v2000_v6 }
0x1631   : > { %3760 = vmatprep.subr.bf16.mxu0 %v4116_v1 }
0x1632   : > { %v4081_v7 = vpop.eup %4080 }
0x1633   : > { %v1995_v9 = vmul.f32 %v4081_v7, %v4077_v59  ;;  %v3424_v7 = vld [vmem:[%s4902_s7 + $0x18] sm:$0xf] }
0x1636   : > { %v4083_v8 = vpop.eup %4082 }
0x1637   : > { %v1997_v11 = vmul.f32 %v4083_v8, %v4079_v0  ;;  %v2273_v8 = vsel %vm1001_vm5, %v3424_v7, 0 }
0x1639   : > { %v1998_v12 = vpack.c.bf16 %v1997_v11, %v1995_v9 }
0x163b   : > { %3751 = vmatmul.mubr.msk.bf16.vlgmr.msra.gmra.mrb[36].mxu0 %vm799_vm4, %v1998_v12 }
0x163c   : > { %3761 = vmatpush3.bf16.msra.mxu0 %v2100_v13  ;;  %3762 = vmatprep.mubr.msk.bf16.mxu0 %vm4117_vm0, %v4116_v1 }
0x163d   : > { %3772 = vmatprep.subr.bf16.mxu0 %v4116_v1 }
0x1643   : > { %3763 = vmatmul.mubr.msk.bf16.vlgmr.msra.gmra.mrb[40].mxu0 %vm749_vm3, %v1920_v43 }
0x1644   : > { %3774 = vmatprep.mubr.msk.bf16.mxu0 %vm4117_vm0, %v4116_v1 }
0x170e   : > { %v2039_v15 = vpop.f32.mrb[36].mxu0 }
0x170f   : > { %v3752_v16 = vpop.f32.mrb[37].mxu0 }
0x1710   : > { %v2042_v20 = vpop.f32.mrb[38].mxu0 }
0x1711   : > { %v2046_v23 = vpack.c.bf16 %v2042_v20, %v2039_v15  ;;  %v3753_v25 = vpop.f32.mrb[39].mxu0 }
0x1713   : > { %3757 = vmatmul.mubr.msk.bf16.vlgmr.msra.gmra.mrb[44].mxu1 %vm749_vm3, %v2046_v23 }
0x1714   : > { %3767 = vmatpush3.bf16.xpose.msra.mxu1 %v2151_v41  ;;  %3768 = vmatprep.mubr.msk.bf16.mxu1 %vm4117_vm0, %v4116_v1 }
0x1715   : > { %3778 = vmatprep.subr.bf16.mxu1 %v4116_v1 }
0x1716   : > { %v2136_v28 = vpop.f32.mrb[40].mxu0 }
0x1717   : > { %v3764_v29 = vpop.f32.mrb[41].mxu0 }
0x1718   : > { %v2139_v30 = vpop.f32.mrb[42].mxu0 }
0x1719   : > { %v3765_v60 = vpop.f32.mrb[43].mxu0 }
0x171b   : > { %3769 = vmatmul.mubr.msk.bf16.vlgmr.msra.gmra.mrb[48].mxu1 %vm749_vm3, %v2144_v31 }
0x171c   : > { %3780 = vmatprep.mubr.msk.bf16.mxu1 %vm4117_vm0, %v4116_v1  ;;  %3779 = vmatpush3.bf16.msra.mxu1 %v2273_v8 }
0x171d   : > { %3790 = vmatprep.subr.bf16.mxu1 %v4116_v1 }
0x17e6   : > { %v2089_v32 = vpop.f32.mrb[44].mxu1 }
0x17e7   : > { %v4599_v63 = vadd.f32 %v2136_v28, %v2089_v32  ;;  %v3758_v33 = vpop.f32.mrb[45].mxu1 }
0x17e8   : > { %v2092_v34 = vpop.f32.mrb[46].mxu1 }
0x17e9   : > { %v4601_v35 = vadd.f32 %v2139_v30, %v2092_v34  ;;  %v3759_v36 = vpop.f32.mrb[47].mxu1 }
0x17ee   : > { %v2187_v37 = vpop.f32.mrb[48].mxu1 }
0x17ef   : > { %v2194_v61 = vmul.f32 0.35355338, %v2187_v37  ;;  %v3770_v38 = vpop.f32.mrb[49].mxu1 }
0x17f0   : > { %v2190_v42 = vpop.f32.mrb[50].mxu1 }
0x17f1   : > { %v2195_v43 = vmul.f32 0.35355338, %v2190_v42  ;;  %v3771_v44 = vpop.f32.mrb[51].mxu1  ;;  %v2196_v47 = vsel %vm799_vm4, %v2194_v61, -inf }
0x17f2   : > { %2197 = vmax.xlane.f32.xlu0 %v2196_v47 }
0x17f3   : > { %v2199_v24 = vsel %vm799_vm4, %v2195_v43, -inf }
0x17f4   : > { %2200 = vmax.xlane.f32.xlu1 %v2199_v24 }
0x1805   : > { %2320 = vrot.lane.b32.xlu1 %v4535_v45, %s4926_s22 }
0x1809   : > { %2318 = vrot.lane.b32.xlu1 %v4535_v45, %s4927_s20 }
0x187f   : > { %v2198_v27 = vpop.xlane.xlu0 %2197 }
0x1880   : > { %v2202_v48 = vsub.f32 %v2194_v61, %v2198_v27 }
0x1881   : > { %v2201_v49 = vpop.xlane.xlu1 %2200 }
0x1882   : > { %v2204_v50 = vmul.f32 1.442695, %v2202_v48  ;;  %v2203_v52 = vsub.f32 %v2195_v43, %v2201_v49 }
0x1884   : > { %4084 = vpow2.f32 %v2204_v50  ;;  %v2206_v53 = vmul.f32 1.442695, %v2203_v52 }
0x1885   : > { %v2321_v4 = vpop.permute.xlu1 %2320 }
0x1886   : > { %4086 = vpow2.f32 %v2206_v53  ;;  %v2326_v5 = vsel %vm749_vm3, %v2321_v4, 0 }
0x1889   : > { %v2319_v6 = vpop.permute.xlu1 %2318 }
0x188e   : > { %v4085_v54 = vpop.eup %4084 }
0x188f   : > { %v2208_v55 = vsel %vm799_vm4, %v4085_v54, 0.0 }
0x1890   : > { %v4087_v56 = vpop.eup %4086  ;;  %2209 = vadd.xlane.f32.xlu0 %v2208_v55 }
0x1891   : > { %v2211_v40 = vsel %vm799_vm4, %v4087_v56, 0.0 }
0x1894   : > { %2212 = vadd.xlane.f32.xlu0 %v2211_v40 }
0x18aa   : > { %2219 = vrot.lane.b32.xlu0 %v4535_v45, %s4928_s27 }
0x191d   : > { %v2210_v57 = vpop.xlane.xlu0 %2209 }
0x191e   : > { %4088 = vrcp.f32 %v2210_v57 }
0x1921   : > { %v2213_v58 = vpop.xlane.xlu0 %2212 }
0x1922   : > { %4090 = vrcp.f32 %v2213_v58 }
0x1925   : > { %v2220_v59 = vpop.permute.xlu0 %2219 }
0x1926   : > { %3773 = vmatpush3.bf16.msra.mxu0 %v2220_v59 }
0x1927   : > { %3784 = vmatprep.subr.bf16.mxu0 %v4116_v1 }
0x1928   : > { %v4089_v62 = vpop.eup %4088 }
0x1929   : > { %v2215_v2 = vmul.f32 %v4089_v62, %v4085_v54 }
0x192c   : > { %v4091_v0 = vpop.eup %4090 }
0x192d   : > { %v2217_v3 = vmul.f32 %v4091_v0, %v4087_v56  ;;  %v2498_v0 = vrot.slane %v4521_v46, %v1447_v51 }
0x192f   : > { %v2218_v14 = vpack.c.bf16 %v2217_v3, %v2215_v2 }
0x1931   : > { %3775 = vmatmul.mubr.msk.bf16.vlgmr.msra.gmra.mrb[44].mxu0 %vm799_vm4, %v2218_v14 }
0x1932   : > { %3785 = vmatpush3.bf16.xpose.msra.mxu0 %v2326_v5  ;;  %3786 = vmatprep.mubr.msk.bf16.mxu0 %vm4117_vm0, %v4116_v1 }
0x1933   : > { %3796 = vmatprep.subr.bf16.mxu0 %v4116_v1 }
0x1939   : > { %3787 = vmatmul.mubr.msk.bf16.vlgmr.msra.gmra.mrb[48].mxu0 %vm749_vm3, %v2319_v6 }
0x193a   : > { %3798 = vmatprep.mubr.msk.bf16.mxu0 %vm4117_vm0, %v4116_v1 }
0x1a04   : > { %v2259_v17 = vpop.f32.mrb[44].mxu0 }
0x1a05   : > { %v3776_v9 = vpop.f32.mrb[45].mxu0 }
0x1a06   : > { %v2262_v11 = vpop.f32.mrb[46].mxu0 }
0x1a07   : > { %v2266_v12 = vpack.c.bf16 %v2262_v11, %v2259_v17  ;;  %v3777_v13 = vpop.f32.mrb[47].mxu0 }
0x1a09   : > { %3781 = vmatmul.mubr.msk.bf16.vlgmr.msra.gmra.mrb[52].mxu1 %vm749_vm3, %v2266_v12 }
0x1a0a   : > { %3792 = vmatprep.mubr.msk.bf16.mxu1 %vm4117_vm0, %v4116_v1 }
0x1a0c   : > { %v2362_v15 = vpop.f32.mrb[48].mxu0 }
0x1a0d   : > { %v2369_v16 = vmul.f32 0.35355338, %v2362_v15  ;;  %v3788_v19 = vpop.f32.mrb[49].mxu0 }
0x1a0e   : > { %v2365_v20 = vpop.f32.mrb[50].mxu0 }
0x1a0f   : > { %v2370_v23 = vmul.f32 0.35355338, %v2365_v20  ;;  %v3789_v25 = vpop.f32.mrb[51].mxu0  ;;  %v2371_v41 = vsel %vm799_vm4, %v2369_v16, -inf }
0x1a10   : > { %2372 = vmax.xlane.f32.xlu1 %v2371_v41  ;;  %v4005_v25 = vld [vmem:[%s4903_s8 + $0x18] sm:$0xff]  }
0x1a11   : > { %v2374_v28 = vsel %vm799_vm4, %v2370_v23, -inf }
0x1a12   : > { %2375 = vmax.xlane.f32.xlu0 %v2374_v28 }
0x1a21   : > { %2394 = vrot.lane.b32.xlu1 %v4535_v45, %s4929_s26  ;;  %v3428_v45 = vld [vmem:[%s4902_s7 + $0x1c] sm:$0xf] }
0x1a22   : > { %v2448_v42 = vsel %vm1001_vm5, %v3428_v45, 0 }
0x1a23   : > { %3797 = vmatpush3.bf16.msra.mxu0 %v2448_v42 }
0x1a24   : > { %3810 = vmatprep.subr.bf16.mxu0 %v4116_v1 }
0x1a9d   : > { %v2373_v29 = vpop.xlane.xlu1 %2372 }
0x1a9e   : > { %v2377_v30 = vsub.f32 %v2369_v16, %v2373_v29 }
0x1a9f   : > { %v2376_v60 = vpop.xlane.xlu0 %2375 }
0x1aa0   : > { %v2379_v31 = vmul.f32 1.442695, %v2377_v30  ;;  %v2378_v32 = vsub.f32 %v2370_v23, %v2376_v60  ;;  %v4004_v23 = vld [vmem:[%s4903_s8 + $0x10] sm:$0xff]  }
0x1aa1   : > { %v2395_v33 = vpop.permute.xlu1 %2394 }
0x1aa2   : > { %4092 = vpow2.f32 %v2379_v31  ;;  %v2381_v34 = vmul.f32 1.442695, %v2378_v32  ;;  %3791 = vmatpush3.bf16.msra.mxu1 %v2395_v33  ;;  %v2530_v33 = vrot.slane %v4521_v46, %v1479_v21  ;;  %v4006_v21 = vld [vmem:[%s4905_s10 + $0x40] sm:$0xff]  }
0x1aa3   : > { %3802 = vmatprep.subr.bf16.mxu1 %v4116_v1 }
0x1aa4   : > { %4094 = vpow2.f32 %v2381_v34 }
0x1aac   : > { %v4093_v36 = vpop.eup %4092 }
0x1aad   : > { %v2383_v37 = vsel %vm799_vm4, %v4093_v36, 0.0 }
0x1aae   : > { %v4095_v61 = vpop.eup %4094  ;;  %2384 = vadd.xlane.f32.xlu0 %v2383_v37 }
0x1aaf   : > { %v2386_v38 = vsel %vm799_vm4, %v4095_v61, 0.0 }
0x1ab2   : > { %2387 = vadd.xlane.f32.xlu0 %v2386_v38  ;;  %v2536_v38 = vrot.slane %v4521_v46, %v1485_v26  ;;  %v4007_v26 = vld [vmem:[%s4905_s10 + $0x48] sm:$0xff]  }
0x1adc   : > { %v2309_v43 = vpop.f32.mrb[52].mxu1 }
0x1add   : > { %v2316_v44 = vadd.f32 %v2309_v43, %v4599_v63  ;;  %v3782_v47 = vpop.f32.mrb[53].mxu1 }
0x1ade   : > { %v2312_v24 = vpop.f32.mrb[54].mxu1  ;;  %v4008_v47 = vld [vmem:[%s4905_s10 + $0x50] sm:$0xff]  }
0x1adf   : > { %v2317_v27 = vadd.f32 %v2312_v24, %v4601_v35  ;;  %v3783_v48 = vpop.f32.mrb[55].mxu1  ;;  %v4009_v24 = vld [vmem:[%s4905_s10 + $0x58] sm:$0xff]  }
0x1ae0   : > { %v4011_v48 = vld [vmem:[%s4905_s10 + $0x68] sm:$0xff]  }
0x1b3b   : > { %v2385_v49 = vpop.xlane.xlu0 %2384 }
0x1b3c   : > { %4096 = vrcp.f32 %v2385_v49  ;;  %v4012_v49 = vld [vmem:[%s4905_s10 + $0x70] sm:$0xff]  }
0x1b3f   : > { %v2388_v50 = vpop.xlane.xlu0 %2387 }
0x1b40   : > { %4098 = vrcp.f32 %v2388_v50  ;;  %v4013_v50 = vld [vmem:[%s4905_s10 + $0x78] sm:$0xff]  }
0x1b46   : > { %v4097_v52 = vpop.eup %4096 }
0x1b47   : > { %v2390_v54 = vmul.f32 %v4097_v52, %v4093_v36  ;;  %v3435_v52 = vld [vmem:[%s4904_s9 + $0x1] ss:$0 sm:$0xff] }
0x1b4a   : > { %v4099_v53 = vpop.eup %4098 }
0x1b4b   : > { %v2392_v55 = vmul.f32 %v4099_v53, %v4095_v61 }
0x1b4d   : > { %v2393_v56 = vpack.c.bf16 %v2392_v55, %v2390_v54 }
0x1b4f   : > { %3793 = vmatmul.mubr.msk.bf16.vlgmr.msra.gmra.mrb[56].mxu1 %vm799_vm4, %v2393_v56 }
0x1b50   : > { %3806 = vmatprep.mubr.msk.bf16.mxu1 %vm4117_vm0, %v4116_v1  ;;  %3803 = vmatpush3.bf16.msra.mxu1 %v4004_v23 }
0x1b51   : > { %3804 = vmatprep.subr.bf16.mxu1 %v4116_v1 }
0x1b54   : > { %3805 = vmatpush3.bf16.msra.mxu1 %v4005_v25 }
0x1b55   : > { %3830 = vmatprep.subr.bf16.mxu1 %v4116_v1 }
0x1c22   : > { %v2434_v63 = vpop.f32.mrb[56].mxu1 }
0x1c23   : > { %v3794_v40 = vpop.f32.mrb[57].mxu1 }
0x1c24   : > { %v2437_v57 = vpop.f32.mrb[58].mxu1 }
0x1c25   : > { %v2441_v58 = vpack.c.bf16 %v2437_v57, %v2434_v63  ;;  %v3795_v35 = vpop.f32.mrb[59].mxu1 }
0x1c27   : > { %3799 = vmatmul.mubr.msk.bf16.vlgmr.msra.gmra.mrb[52].mxu0 %vm749_vm3, %v2441_v58 }
0x1c28   : > { %3826 = vmatprep.mubr.msk.bf16.mxu0 %vm4117_vm0, %v4116_v1  ;;  %3811 = vmatpush3.bf16.msra.mxu0 %v4006_v21 }
0x1c29   : > { %3812 = vmatprep.subr.bf16.mxu0 %v4116_v1 }
0x1c2c   : > { %3813 = vmatpush3.bf16.msra.mxu0 %v4007_v26 }
0x1c2d   : > { %3814 = vmatprep.subr.bf16.mxu0 %v4116_v1 }
0x1c30   : > { %3815 = vmatpush3.bf16.msra.mxu0 %v4008_v47 }
0x1c31   : > { %3816 = vmatprep.subr.bf16.mxu0 %v4116_v1 }
0x1c34   : > { %3817 = vmatpush3.bf16.msra.mxu0 %v4009_v24 }
0x1c35   : > { %3818 = vmatprep.subr.bf16.mxu0 %v4116_v1 }
0x1cfa   : > { %v2484_v59 = vpop.f32.mrb[52].mxu0 }
0x1cfb   : > { %v2491_v62 = vadd.f32 %v2484_v59, %v2316_v44  ;;  %v3800_v2 = vpop.f32.mrb[53].mxu0 }
0x1cfc   : > { %v2487_v3 = vpop.f32.mrb[54].mxu0 }
0x1cfd   : > { %v2493_v4 = vadd.f32 %v2491_v62, %v4497_v18  ;;  %v2492_v14 = vadd.f32 %v2487_v3, %v2317_v27  ;;  %v3801_v5 = vpop.f32.mrb[55].mxu0  ;;  %v4010_v27 = vld [vmem:[%s4905_s10 + $0x60] sm:$0xff]  }
0x1cfe   : > { %3819 = vmatpush3.bf16.msra.mxu0 %v4010_v27 }
0x1cff   : > { %v4654_v6 = vadd.f32 %v2498_v0, %v2493_v4  ;;  %v2494_v7 = vadd.f32 %v2492_v14, %v4500_v22  ;;  %3820 = vmatprep.subr.bf16.mxu0 %v4116_v1 }
0x1d01   : > { %v4657_v8 = vadd.f32 %v2498_v0, %v2494_v7  ;;  %v2501_v17 = vsel %vm637_vm2, %v4654_v6, 0.0 }
0x1d02   : > { %2502 = vadd.xlane.f32.xlu0 %v2501_v17  ;;  %3821 = vmatpush3.bf16.msra.mxu0 %v4011_v48 }
0x1d03   : > { %v2504_v9 = vsel %vm637_vm2, %v4657_v8, 0.0  ;;  %3822 = vmatprep.subr.bf16.mxu0 %v4116_v1 }
0x1d06   : > { %2505 = vadd.xlane.f32.xlu0 %v2504_v9  ;;  %3823 = vmatpush3.bf16.msra.mxu0 %v4012_v49 }
0x1d07   : > { %3824 = vmatprep.subr.bf16.mxu0 %v4116_v1 }
0x1d0a   : > { %3825 = vmatpush3.bf16.msra.mxu0 %v4013_v50  ;;  %v4018_v50 = vld [vmem:[%s4910_s15] sm:$0xff]  }
0x1d0b   : > { %3850 = vmatprep.subr.bf16.mxu0 %v4018_v50 }
0x1d8f   : > { %v2503_v51 = vpop.xlane.xlu0 %2502 }
0x1d90   : > { %v2507_v11 = vmul.f32 0.03125, %v2503_v51 }
0x1d92   : > { %v2509_v18 = vsub.f32 %v4654_v6, %v2507_v11 }
0x1d93   : > { %v2506_v12 = vpop.xlane.xlu0 %2505 }
0x1d94   : > { %v2508_v13 = vmul.f32 0.03125, %v2506_v12  ;;  %v2511_v15 = vmul.f32 %v2509_v18, %v2509_v18 }
0x1d96   : > { %v2510_v16 = vsub.f32 %v4657_v8, %v2508_v13  ;;  %v2513_v22 = vsel %vm637_vm2, %v2511_v15, 0.0  ;;  %v4014_v15 = vld [vmem:[%s4906_s11] sm:$0xff]  }
0x1d97   : > { %2514 = vadd.xlane.f32.xlu0 %v2513_v22  ;;  %v2648_v22 = vrot.slane %v4521_v46, %v1594_v10  ;;  %v3463_v10 = vld [vmem:[%s4907_s12] ss:$0 sm:$0xff] }
0x1d98   : > { %v2512_v19 = vmul.f32 %v2510_v16, %v2510_v16 }
0x1d9a   : > { %v2516_v20 = vsel %vm637_vm2, %v2512_v19, 0.0 }
0x1d9b   : > { %2517 = vadd.xlane.f32.xlu0 %v2516_v20 }
0x1e24   : > { %v2515_v41 = vpop.xlane.xlu0 %2514 }
0x1e25   : > { %v2519_v28 = vmul.f32 0.03125, %v2515_v41 }
0x1e27   : > { %v2521_v29 = vadd.f32 1e-05, %v2519_v28 }
0x1e28   : > { %v2518_v30 = vpop.xlane.xlu0 %2517 }
0x1e29   : > { %4100 = vrsqrt.f32 %v2521_v29  ;;  %v2520_v60 = vmul.f32 0.03125, %v2518_v30 }
0x1e2b   : > { %v2522_v31 = vadd.f32 1e-05, %v2520_v60  ;;  %v4016_v60 = vld [vmem:[%s4908_s13] sm:$0xff]  }
0x1e2d   : > { %4102 = vrsqrt.f32 %v2522_v31 }
0x1e33   : > { %v4101_v32 = vpop.eup %4100 }
0x1e34   : > { %v2525_v34 = vmul.f32 %v4101_v32, %v2509_v18 }
0x1e36   : > { %v2531_v37 = vmul.f32 %v2530_v33, %v2525_v34 }
0x1e37   : > { %v4103_v36 = vpop.eup %4102 }
0x1e38   : > { %v2526_v61 = vmul.f32 %v4103_v36, %v2510_v16  ;;  %v2537_v42 = vadd.f32 %v2536_v38, %v2531_v37  ;;  %v4015_v16 = vld [vmem:[%s4906_s11 + $0x8] sm:$0xff]  }
0x1e3a   : > { %v2532_v45 = vmul.f32 %v2530_v33, %v2526_v61 }
0x1e3c   : > { %v2538_v43 = vadd.f32 %v2536_v38, %v2532_v45 }
0x1e3e   : > { %v2539_v44 = vpack.c.bf16 %v2538_v43, %v2537_v42 }
0x1e40   : > { %3807 = vmatmul.mubr.msk.bf16.vlgmr.msra.gmra.mrb[60].mxu1 %vm637_vm2, %v2539_v44 }
0x1e41   : > { %3834 = vmatprep.mubr.msk.bf16.mxu1 %vm4117_vm0, %v4116_v1  ;;  %3831 = vmatpush3.bf16.msra.mxu1 %v4014_v15 }
0x1e42   : > { %3832 = vmatprep.subr.bf16.mxu1 %v4116_v1 }
0x1e45   : > { %3833 = vmatpush3.bf16.msra.mxu1 %v4015_v16 }
0x1e46   : > { %3838 = vmatprep.subr.bf16.mxu1 %v4016_v60 }
0x1f13   : > { %v2602_v53 = vpop.f32.mrb[60].mxu1 }
0x1f14   : > { %v2603_v54 = vadd.f32 %v3435_v52, %v2602_v53  ;;  %v3808_v55 = vpop.f32.mrb[61].mxu1  ;;  %v3467_v53 = vld [vmem:[%s4909_s14] ss:$0 sm:$0xff] }
0x1f15   : > { %v2605_v56 = vpop.f32.mrb[62].mxu1 }
0x1f16   : > { %v2609_v63 = vmul.f32 %v2603_v54, %v2603_v54  ;;  %v2606_v40 = vadd.f32 %v3435_v52, %v2605_v56  ;;  %v3809_v57 = vpop.f32.mrb[63].mxu1  ;;  %v4019_v52 = vld [vmem:[%s4910_s15 + $0x8] sm:$0xff]  }
0x1f18   : > { %v2611_v58 = vmul.f32 %v2609_v63, %v2603_v54  ;;  %v2610_v35 = vmul.f32 %v2606_v40, %v2606_v40 }
0x1f1a   : > { %v2613_v59 = vmul.f32 0.044715, %v2611_v58  ;;  %v2612_v62 = vmul.f32 %v2610_v35, %v2606_v40 }
0x1f1c   : > { %v2615_v0 = vadd.f32 %v2613_v59, %v2603_v54  ;;  %v2614_v2 = vmul.f32 0.044715, %v2612_v62 }
0x1f1e   : > { %v2617_v3 = vmul.f32 0.7978846, %v2615_v0  ;;  %v2616_v4 = vadd.f32 %v2614_v2, %v2606_v40 }
0x1f20   : > { %4104 = vtanh.f32 %v2617_v3  ;;  %v2618_v14 = vmul.f32 0.7978846, %v2616_v4 }
0x1f22   : > { %4106 = vtanh.f32 %v2618_v14 }
0x1f2a   : > { %v4105_v5 = vpop.eup %4104 }
0x1f2b   : > { %v2621_v7 = vadd.f32 1.0, %v4105_v5 }
0x1f2c   : > { %v4107_v17 = vpop.eup %4106 }
0x1f2d   : > { %v2623_v9 = vmul.f32 0.5, %v2621_v7  ;;  %v2622_v51 = vadd.f32 1.0, %v4107_v17 }
0x1f2f   : > { %v2624_v11 = vmul.f32 0.5, %v2622_v51  ;;  %v2625_v18 = vmul.f32 %v2623_v9, %v2603_v54 }
0x1f31   : > { %v2626_v12 = vmul.f32 %v2624_v11, %v2606_v40 }
0x1f33   : > { %v2627_v13 = vpack.c.bf16 %v2626_v12, %v2625_v18 }
0x1f35   : > { %3827 = vmatmul.mubr.bf16.vlgmr.msra.gmra.mrb[56].mxu0 %v2627_v13 }
0x1f36   : > { %3851 = vmatpush3.bf16.msra.mxu0 %v4018_v50 }
0x1f37   : > { %3852 = vmatprep.subr.bf16.mxu0 %v4019_v52 }
0x1f3a   : > { %3853 = vmatpush3.bf16.msra.mxu0 %v4019_v52 }
0x2008   : > { %v2731_v19 = vpop.f32.mrb[56].mxu0 }
0x2009   : > { %v2732_v20 = vadd.f32 %v2731_v19, %v2648_v22  ;;  %v3828_v23 = vpop.f32.mrb[57].mxu0 }
0x200a   : > { %v2734_v25 = vpop.f32.mrb[58].mxu0 }
0x200b   : > { %v2735_v41 = vadd.f32 %v2734_v25, %v2648_v22  ;;  %v3829_v28 = vpop.f32.mrb[59].mxu0  ;;  %v2738_v29 = vadd.f32 %v2732_v20, %v4654_v6 }
0x200d   : > { %v2739_v30 = vadd.f32 %v2735_v41, %v4657_v8 }
0x200f   : > { %v2745_v1 = vpack.c.bf16 %v2739_v30, %v2738_v29 }
0x2011   : > { %3835 = vmatmul.mubr.msk.bf16.vlgmr.msra.gmra.mrb[64].mxu1 %vm637_vm2, %v2745_v1 }
0x2012   : > { %3839 = vmatpush3.bf16.msra.mxu1 %v4016_v60 }
0x2013   : > { %3840 = vmatprep.subr.bf16.mxu1 %v4017_v39 }
0x2016   : > { %3841 = vmatpush3.bf16.msra.mxu1 %v4017_v39 }
0x2017   : > { %3886 = vmatprep.subr.bf16.mxu1 %v4018_v50 }
0x20e4   : > { %v2801_v46 = vpop.f32.mrb[64].mxu1 }
0x20e5   : > { %v2802_v6 = vadd.f32 %v3463_v10, %v2801_v46  ;;  %v3836_v8 = vpop.f32.mrb[65].mxu1 }
0x20e6   : > { %v2804_v31 = vpop.f32.mrb[66].mxu1 }
0x20e7   : > { %v2805_v32 = vadd.f32 %v3463_v10, %v2804_v31  ;;  %v3837_v33 = vpop.f32.mrb[67].mxu1  ;;  %v2808_v34 = vmax.f32 %v2802_v6, 0.0 }
0x20e9   : > { %v2809_v36 = vmax.f32 %v2805_v32, 0.0 }
0x20eb   : > { %v3917_v37 = vpack.i.bf16 %v2809_v36, %v2808_v34  ;;  %v2835_v61 = vpack.c.bf16 %v2809_v36, %v2808_v34 }
0x20ed   : > { %3918 = vrot.lane.b32.xlu0 %v3917_v37, %s4928_s27  ;;  %3913 = vrot.lane.b32.xlu1 %v3917_v37, %s4118_s29 }
0x20ee   : > { %3842 = vmatprep.mubr.msk.bf16.mxu1 %vm637_vm2, %v2835_v61 }
0x20f1   : > { %3923 = vrot.lane.b32.xlu1 %v3917_v37, %s4129_s0 }
0x215f   : > { %v3919_v38 = vpop.permute.xlu0 %3918  ;;  %v3914_v45 = vpop.permute.xlu1 %3913 }
0x2160   : > { %v3921_v42 = vunpack.i.h.bf16 %v3919_v38  ;;  %v3920_v43 = vunpack.i.l.bf16 %v3919_v38  ;;  %v3916_v44 = vunpack.i.h.bf16 %v3914_v45  ;;  %v3915_v21 = vunpack.i.l.bf16 %v3914_v45 }
0x2162   : > { %v2837_v26 = vpack.c.bf16 %v3921_v42, %v3920_v43  ;;  %v2836_v47 = vpack.c.bf16 %v3916_v44, %v3915_v21 }
0x2163   : > { %v3924_v24 = vpop.permute.xlu1 %3923 }
0x2164   : > { %3843 = vmatmul.mubr.msk.bf16.vlgmr.msra.gmra.mrb[68].mxu1 %vm637_vm2, %v2836_v47  ;;  %v3926_v27 = vunpack.i.h.bf16 %v3924_v24  ;;  %v3925_v48 = vunpack.i.l.bf16 %v3924_v24 }
0x2165   : > { %3846 = vmatprep.mubr.msk.bf16.mxu1 %vm637_vm2, %v2837_v26  ;;  %3888 = vmatpush3.bf16.msra.mxu1 %v4018_v50 }
0x2166   : > { %v2838_v49 = vpack.c.bf16 %v3926_v27, %v3925_v48  ;;  %3887 = vmatprep.subr.bf16.mxu1 %v4019_v52 }
0x2169   : > { %3889 = vmatpush3.bf16.msra.mxu1 %v4019_v52 }
0x216c   : > { %3847 = vmatmul.mubr.msk.bf16.gmra.mrb[72].mxu1 %vm637_vm2, %v2838_v49 }
0x2237   : > { %v3844_v54 = vpop.f32.mrb[68].mxu1 }
0x2238   : > { %v2912_v55 = vadd.f32 %v3844_v54, %v3467_v53  ;;  %v2903_v56 = vpop.f32.mrb[69].mxu1 }
0x2239   : > { %v2904_v63 = vadd.f32 %v3467_v53, %v2903_v56  ;;  %v3845_v40 = vpop.f32.mrb[70].mxu1 }
0x223a   : > { %v2915_v57 = vadd.f32 %v3845_v40, %v3467_v53  ;;  %v2906_v58 = vpop.f32.mrb[71].mxu1  ;;  %v2936_v59 = vmax.f32 %v2912_v55, 0.0 }
0x223b   : > { %v2907_v35 = vadd.f32 %v3467_v53, %v2906_v58  ;;  %v2934_v0 = vmax.f32 %v2904_v63, 0.0 }
0x223c   : > { %v2937_v62 = vmax.f32 %v2915_v57, 0.0 }
0x223d   : > { %v2935_v2 = vmax.f32 %v2907_v35, 0.0 }
0x223e   : > { %v3028_v3 = vpack.c.bf16 %v2937_v62, %v2936_v59  ;;  %v3962_v4 = vpack.i.bf16 %v2937_v62, %v2936_v59 }
0x223f   : > { %v3848_v14 = vpop.f32.mrb[72].mxu1  ;;  %v3027_v5 = vpack.c.bf16 %v2935_v2, %v2934_v0  ;;  %v3937_v7 = vpack.i.bf16 %v2935_v2, %v2934_v0 }
0x2240   : > { %v2928_v17 = vadd.f32 %v3848_v14, %v3467_v53  ;;  %v2919_v9 = vpop.f32.mrb[73].mxu1 }
0x2241   : > { %v2920_v51 = vadd.f32 %v3467_v53, %v2919_v9  ;;  %v3849_v11 = vpop.f32.mrb[74].mxu1  ;;  %3854 = vmatprep.mubr.msk.bf16.mxu0 %vm637_vm2, %v3027_v5 }
0x2242   : > { %v2931_v18 = vadd.f32 %v3849_v11, %v3467_v53  ;;  %v2922_v12 = vpop.f32.mrb[75].mxu1  ;;  %3855 = vmatmul.mubr.msk.bf16.vlgmr.msra.gmra.mrb[60].mxu0 %vm637_vm2, %v3028_v3  ;;  %v2940_v15 = vmax.f32 %v2928_v17, 0.0 }
0x2243   : > { %v2923_v13 = vadd.f32 %v3467_v53, %v2922_v12  ;;  %v2938_v22 = vmax.f32 %v2920_v51, 0.0 }
0x2244   : > { %v2941_v16 = vmax.f32 %v2931_v18, 0.0 }
0x2245   : > { %v2939_v19 = vmax.f32 %v2923_v13, 0.0 }
0x2246   : > { %v3952_v20 = vpack.i.bf16 %v2941_v16, %v2940_v15  ;;  %v3030_v23 = vpack.c.bf16 %v2941_v16, %v2940_v15 }
0x2247   : > { %v3927_v25 = vpack.i.bf16 %v2939_v19, %v2938_v22  ;;  %v3029_v41 = vpack.c.bf16 %v2939_v19, %v2938_v22 }
0x2248   : > { %3953 = vrot.lane.b32.xlu0 %v3952_v20, %s4928_s27 }
0x2249   : > { %3928 = vrot.lane.b32.xlu1 %v3927_v25, %s4118_s29  ;;  %3858 = vmatprep.mubr.msk.bf16.mxu0 %vm637_vm2, %v3029_v41 }
0x224a   : > { %3859 = vmatmul.mubr.msk.bf16.gmra.mrb[64].mxu0 %vm637_vm2, %v3030_v23 }
0x224c   : > { %3963 = vrot.lane.b32.xlu0 %v3962_v4, %s4129_s0 }
0x224d   : > { %3933 = vrot.lane.b32.xlu1 %v3952_v20, %s4118_s29 }
0x2250   : > { %3973 = vrot.lane.b32.xlu0 %v3927_v25, %s4129_s0 }
0x2251   : > { %3938 = vrot.lane.b32.xlu1 %v3937_v7, %s4928_s27 }
0x2254   : > { %3983 = vrot.lane.b32.xlu0 %v3952_v20, %s4129_s0 }
0x2255   : > { %3943 = vrot.lane.b32.xlu1 %v3962_v4, %s4928_s27 }
0x2259   : > { %3948 = vrot.lane.b32.xlu1 %v3927_v25, %s4928_s27 }
0x225d   : > { %3958 = vrot.lane.b32.xlu1 %v3937_v7, %s4129_s0 }
0x2261   : > { %3968 = vrot.lane.b32.xlu1 %v3937_v7, %s4118_s29  ;;  %v4789_v7 = vld [vmem:[%s4911_s16] ss:$0 sm:$0xff] }
0x2265   : > { %3978 = vrot.lane.b32.xlu1 %v3962_v4, %s4118_s29  ;;  %s4930_s29 = sadd.s32 4294967295, %s4114_s24  }
0x2266   : > { %s3366_s27 = sshll.u32 %s4930_s29, 5 }
0x2267   : > { %p547_p4 = scmp.lt.s32.totalorder %s3366_s27, 63 }
0x2269   : > { %s4934_s27 = smov (!%p547_p4, %s3366_s27), 63 }
0x226a   : > { %s3367_s23 = sshll.u32 %s4934_s27, 3 }
0x226b   : > { %s4794_s30 = scalar_lea.vmem %s4912_s17, %s3367_s23 }
0x22ba   : > { %v3954_v34 = vpop.permute.xlu0 %3953 }
0x22bb   : > { %v3929_v28 = vpop.permute.xlu1 %3928  ;;  %v3956_v43 = vunpack.i.h.bf16 %v3954_v34  ;;  %v3955_v44 = vunpack.i.l.bf16 %v3954_v34 }
0x22bc   : > { %v3931_v29 = vunpack.i.h.bf16 %v3929_v28  ;;  %v3930_v30 = vunpack.i.l.bf16 %v3929_v28 }
0x22bd   : > { %v3038_v48 = vpack.c.bf16 %v3956_v43, %v3955_v44 }
0x22be   : > { %v3033_v1 = vpack.c.bf16 %v3931_v29, %v3930_v30  ;;  %v3964_v21 = vpop.permute.xlu0 %3963 }
0x22bf   : > { %v3934_v60 = vpop.permute.xlu1 %3933  ;;  %v3966_v55 = vunpack.i.h.bf16 %v3964_v21  ;;  %v3965_v56 = vunpack.i.l.bf16 %v3964_v21 }
0x22c0   : > { %v3936_v39 = vunpack.i.h.bf16 %v3934_v60  ;;  %v3935_v10 = vunpack.i.l.bf16 %v3934_v60  ;;  %3866 = vmatprep.mubr.msk.bf16.mxu1 %vm637_vm2, %v3033_v1 }
0x22c1   : > { %v3040_v62 = vpack.c.bf16 %v3966_v55, %v3965_v56 }
0x22c2   : > { %v3034_v46 = vpack.c.bf16 %v3936_v39, %v3935_v10  ;;  %v3974_v52 = vpop.permute.xlu0 %3973 }
0x22c3   : > { %v3939_v6 = vpop.permute.xlu1 %3938  ;;  %v3976_v40 = vunpack.i.h.bf16 %v3974_v52  ;;  %v3975_v57 = vunpack.i.l.bf16 %v3974_v52 }
0x22c4   : > { %v3941_v8 = vunpack.i.h.bf16 %v3939_v6  ;;  %v3940_v31 = vunpack.i.l.bf16 %v3939_v6  ;;  %3867 = vmatmul.mubr.msk.bf16.vlgmr.msra.gmra.mrb[76].mxu1 %vm637_vm2, %v3034_v46 }
0x22c5   : > { %v3041_v2 = vpack.c.bf16 %v3976_v40, %v3975_v57 }
0x22c6   : > { %v3035_v32 = vpack.c.bf16 %v3941_v8, %v3940_v31  ;;  %v3984_v3 = vpop.permute.xlu0 %3983 }
0x22c7   : > { %v3944_v33 = vpop.permute.xlu1 %3943  ;;  %v3986_v4 = vunpack.i.h.bf16 %v3984_v3  ;;  %v3985_v14 = vunpack.i.l.bf16 %v3984_v3 }
0x22c8   : > { %v3946_v36 = vunpack.i.h.bf16 %v3944_v33  ;;  %v3945_v37 = vunpack.i.l.bf16 %v3944_v33  ;;  %3870 = vmatprep.mubr.msk.bf16.mxu1 %vm637_vm2, %v3035_v32 }
0x22c9   : > { %v3042_v5 = vpack.c.bf16 %v3986_v4, %v3985_v14 }
0x22ca   : > { %v3036_v61 = vpack.c.bf16 %v3946_v36, %v3945_v37 }
0x22cb   : > { %v3949_v38 = vpop.permute.xlu1 %3948 }
0x22cc   : > { %v3951_v45 = vunpack.i.h.bf16 %v3949_v38  ;;  %v3950_v42 = vunpack.i.l.bf16 %v3949_v38  ;;  %3871 = vmatmul.mubr.msk.bf16.gmra.mrb[80].mxu1 %vm637_vm2, %v3036_v61 }
0x22ce   : > { %v3037_v26 = vpack.c.bf16 %v3951_v45, %v3950_v42 }
0x22cf   : > { %v3959_v47 = vpop.permute.xlu1 %3958 }
0x22d0   : > { %v3961_v24 = vunpack.i.h.bf16 %v3959_v47  ;;  %v3960_v27 = vunpack.i.l.bf16 %v3959_v47  ;;  %3874 = vmatprep.mubr.msk.bf16.mxu1 %vm637_vm2, %v3037_v26 }
0x22d2   : > { %v3039_v49 = vpack.c.bf16 %v3961_v24, %v3960_v27 }
0x22d3   : > { %v3969_v50 = vpop.permute.xlu1 %3968 }
0x22d4   : > { %v3971_v53 = vunpack.i.h.bf16 %v3969_v50  ;;  %v3970_v54 = vunpack.i.l.bf16 %v3969_v50  ;;  %3875 = vmatmul.mubr.msk.bf16.gmra.mrb[84].mxu1 %vm637_vm2, %v3038_v48 }
0x22d5   : > { %3878 = vmatprep.mubr.msk.bf16.mxu1 %vm637_vm2, %v3039_v49 }
0x22d6   : > { %v3031_v63 = vpack.c.bf16 %v3971_v53, %v3970_v54 }
0x22d7   : > { %v3979_v58 = vpop.permute.xlu1 %3978 }
0x22d8   : > { %v3981_v35 = vunpack.i.h.bf16 %v3979_v58  ;;  %v3980_v59 = vunpack.i.l.bf16 %v3979_v58  ;;  %3862 = vmatprep.mubr.msk.bf16.mxu0 %vm637_vm2, %v3031_v63 }
0x22da   : > { %v3032_v0 = vpack.c.bf16 %v3981_v35, %v3980_v59 }
0x22dc   : > { %3863 = vmatmul.mubr.msk.bf16.gmra.mrb[68].mxu0 %vm637_vm2, %v3032_v0  ;;  %3879 = vmatmul.mubr.msk.bf16.gmra.mrb[88].mxu1 %vm637_vm2, %v3040_v62 }
0x22dd   : > { %3882 = vmatprep.mubr.msk.bf16.mxu1 %vm637_vm2, %v3041_v2 }
0x22e4   : > { %3883 = vmatmul.mubr.msk.bf16.gmra.mrb[92].mxu1 %vm637_vm2, %v3042_v5 }
0x2315   : > { %v3856_v17 = vpop.f32.mrb[60].mxu0 }
0x2316   : > { %v3152_v9 = vadd.f32 %v3856_v17, %v4789_v7  ;;  %v3143_v51 = vpop.f32.mrb[61].mxu0 }
0x2317   : > { %v3144_v11 = vadd.f32 %v4789_v7, %v3143_v51  ;;  %v3857_v18 = vpop.f32.mrb[62].mxu0 }
0x2318   : > { %3273 = vst.msk [vmem:[%s4794_s30 + $0x10] sm:$0xff] %vm3270_vm6, %v3152_v9  ;;  %v3155_v12 = vadd.f32 %v3857_v18, %v4789_v7  ;;  %v3146_v13 = vpop.f32.mrb[63].mxu0 }
0x2319   : > { %3271 = vst.msk [vmem:[%s4794_s30] sm:$0xff] %vm3270_vm6, %v3144_v11  ;;  %v3147_v15 = vadd.f32 %v4789_v7, %v3146_v13 }
0x231a   : > { %3274 = vst.msk [vmem:[%s4794_s30 + $0x18] sm:$0xff] %vm3270_vm6, %v3155_v12 }
0x231b   : > { %3272 = vst.msk [vmem:[%s4794_s30 + $0x8] sm:$0xff] %vm3270_vm6, %v3147_v15 }
0x231d   : > { %v3860_v16 = vpop.f32.mrb[64].mxu0 }
0x231e   : > { %v3168_v22 = vadd.f32 %v3860_v16, %v4789_v7  ;;  %v3159_v19 = vpop.f32.mrb[65].mxu0 }
0x231f   : > { %v3160_v20 = vadd.f32 %v4789_v7, %v3159_v19  ;;  %v3861_v23 = vpop.f32.mrb[66].mxu0 }
0x2320   : > { %3277 = vst.msk [vmem:[%s4794_s30 + $0x30] sm:$0xff] %vm3270_vm6, %v3168_v22  ;;  %v3171_v25 = vadd.f32 %v3861_v23, %v4789_v7  ;;  %v3162_v41 = vpop.f32.mrb[67].mxu0 }
0x2321   : > { %3275 = vst.msk [vmem:[%s4794_s30 + $0x20] sm:$0xff] %vm3270_vm6, %v3160_v20  ;;  %v3163_v28 = vadd.f32 %v4789_v7, %v3162_v41 }
0x2322   : > { %3278 = vst.msk [vmem:[%s4794_s30 + $0x38] sm:$0xff] %vm3270_vm6, %v3171_v25 }
0x2323   : > { %3276 = vst.msk [vmem:[%s4794_s30 + $0x28] sm:$0xff] %vm3270_vm6, %v3163_v28 }
0x2397   : > { %v3868_v29 = vpop.f32.mrb[76].mxu1 }
0x2398   : > { %v3200_v30 = vadd.f32 %v3868_v29, %v4789_v7  ;;  %v3191_v1 = vpop.f32.mrb[77].mxu1 }
0x2399   : > { %v3192_v60 = vadd.f32 %v4789_v7, %v3191_v1  ;;  %v3869_v39 = vpop.f32.mrb[78].mxu1 }
0x239a   : > { %3285 = vst.msk [vmem:[%s4794_s30 + $0x70] sm:$0xff] %vm3270_vm6, %v3200_v30  ;;  %v3203_v10 = vadd.f32 %v3869_v39, %v4789_v7  ;;  %v3194_v46 = vpop.f32.mrb[79].mxu1 }
0x239b   : > { %3283 = vst.msk [vmem:[%s4794_s30 + $0x60] sm:$0xff] %vm3270_vm6, %v3192_v60  ;;  %v3195_v6 = vadd.f32 %v4789_v7, %v3194_v46 }
0x239c   : > { %3286 = vst.msk [vmem:[%s4794_s30 + $0x78] sm:$0xff] %vm3270_vm6, %v3203_v10 }
0x239d   : > { %3284 = vst.msk [vmem:[%s4794_s30 + $0x68] sm:$0xff] %vm3270_vm6, %v3195_v6 }
0x239f   : > { %v3872_v8 = vpop.f32.mrb[80].mxu1 }
0x23a0   : > { %v3216_v31 = vadd.f32 %v3872_v8, %v4789_v7  ;;  %v3207_v32 = vpop.f32.mrb[81].mxu1 }
0x23a1   : > { %v3208_v33 = vadd.f32 %v4789_v7, %v3207_v32  ;;  %v3873_v34 = vpop.f32.mrb[82].mxu1 }
0x23a2   : > { %3289 = vst.msk [vmem:[%s4794_s30 + $0x90] sm:$0xff] %vm3270_vm6, %v3216_v31  ;;  %v3219_v36 = vadd.f32 %v3873_v34, %v4789_v7  ;;  %v3210_v37 = vpop.f32.mrb[83].mxu1 }
0x23a3   : > { %3287 = vst.msk [vmem:[%s4794_s30 + $0x80] sm:$0xff] %vm3270_vm6, %v3208_v33  ;;  %v3211_v61 = vadd.f32 %v4789_v7, %v3210_v37 }
0x23a4   : > { %3290 = vst.msk [vmem:[%s4794_s30 + $0x98] sm:$0xff] %vm3270_vm6, %v3219_v36 }
0x23a5   : > { %3288 = vst.msk [vmem:[%s4794_s30 + $0x88] sm:$0xff] %vm3270_vm6, %v3211_v61 }
0x23a7   : > { %v3876_v38 = vpop.f32.mrb[84].mxu1 }
0x23a8   : > { %v3232_v45 = vadd.f32 %v3876_v38, %v4789_v7  ;;  %v3223_v42 = vpop.f32.mrb[85].mxu1 }
0x23a9   : > { %v3224_v43 = vadd.f32 %v4789_v7, %v3223_v42  ;;  %v3877_v44 = vpop.f32.mrb[86].mxu1 }
0x23aa   : > { %3293 = vst.msk [vmem:[%s4794_s30 + $0xb0] sm:$0xff] %vm3270_vm6, %v3232_v45  ;;  %v3235_v21 = vadd.f32 %v3877_v44, %v4789_v7  ;;  %v3226_v26 = vpop.f32.mrb[87].mxu1 }
0x23ab   : > { %3291 = vst.msk [vmem:[%s4794_s30 + $0xa0] sm:$0xff] %vm3270_vm6, %v3224_v43  ;;  %v3227_v47 = vadd.f32 %v4789_v7, %v3226_v26 }
0x23ac   : > { %3294 = vst.msk [vmem:[%s4794_s30 + $0xb8] sm:$0xff] %vm3270_vm6, %v3235_v21 }
0x23ad   : > { %3292 = vst.msk [vmem:[%s4794_s30 + $0xa8] sm:$0xff] %vm3270_vm6, %v3227_v47 }
0x23af   : > { %v3864_v24 = vpop.f32.mrb[68].mxu0  ;;  %v3880_v27 = vpop.f32.mrb[88].mxu1 }
0x23b0   : > { %v3184_v48 = vadd.f32 %v3864_v24, %v4789_v7  ;;  %v3248_v49 = vadd.f32 %v3880_v27, %v4789_v7  ;;  %v3175_v50 = vpop.f32.mrb[69].mxu0  ;;  %v3239_v52 = vpop.f32.mrb[89].mxu1 }
0x23b1   : > { %v3176_v53 = vadd.f32 %v4789_v7, %v3175_v50  ;;  %v3240_v54 = vadd.f32 %v4789_v7, %v3239_v52  ;;  %v3865_v55 = vpop.f32.mrb[70].mxu0  ;;  %v3881_v56 = vpop.f32.mrb[90].mxu1 }
0x23b2   : > { %3281 = vst.msk [vmem:[%s4794_s30 + $0x50] sm:$0xff] %vm3270_vm6, %v3184_v48  ;;  %3297 = vst.msk [vmem:[%s4794_s30 + $0xd0] sm:$0xff] %vm3270_vm6, %v3248_v49  ;;  %v3187_v63 = vadd.f32 %v3865_v55, %v4789_v7  ;;  %v3251_v40 = vadd.f32 %v3881_v56, %v4789_v7  ;;  %v3178_v57 = vpop.f32.mrb[71].mxu0  ;;  %v3242_v58 = vpop.f32.mrb[91].mxu1 }
0x23b3   : > { %3279 = vst.msk [vmem:[%s4794_s30 + $0x40] sm:$0xff] %vm3270_vm6, %v3176_v53  ;;  %3295 = vst.msk [vmem:[%s4794_s30 + $0xc0] sm:$0xff] %vm3270_vm6, %v3240_v54  ;;  %v3179_v35 = vadd.f32 %v4789_v7, %v3178_v57  ;;  %v3243_v59 = vadd.f32 %v4789_v7, %v3242_v58 }
0x23b4   : > { %3282 = vst.msk [vmem:[%s4794_s30 + $0x58] sm:$0xff] %vm3270_vm6, %v3187_v63  ;;  %3298 = vst.msk [vmem:[%s4794_s30 + $0xd8] sm:$0xff] %vm3270_vm6, %v3251_v40 }
0x23b5   : > { %3280 = vst.msk [vmem:[%s4794_s30 + $0x48] sm:$0xff] %vm3270_vm6, %v3179_v35  ;;  %3296 = vst.msk [vmem:[%s4794_s30 + $0xc8] sm:$0xff] %vm3270_vm6, %v3243_v59 }
0x23b7   : > { %v3884_v62 = vpop.f32.mrb[92].mxu1 }
0x23b8   : > { %v3264_v0 = vadd.f32 %v3884_v62, %v4789_v7  ;;  %v3255_v2 = vpop.f32.mrb[93].mxu1 }
0x23b9   : > { %v3256_v3 = vadd.f32 %v4789_v7, %v3255_v2  ;;  %v3885_v4 = vpop.f32.mrb[94].mxu1 }
0x23ba   : > { %3301 = vst.msk [vmem:[%s4794_s30 + $0xf0] sm:$0xff] %vm3270_vm6, %v3264_v0  ;;  %v3267_v14 = vadd.f32 %v3885_v4, %v4789_v7  ;;  %v3258_v5 = vpop.f32.mrb[95].mxu1 }
0x23bb   : > { %3299 = vst.msk [vmem:[%s4794_s30 + $0xe0] sm:$0xff] %vm3270_vm6, %v3256_v3  ;;  %v3259_v17 = vadd.f32 %v4789_v7, %v3258_v5 }
0x23bc   : > { %3302 = vst.msk [vmem:[%s4794_s30 + $0xf8] sm:$0xff] %vm3270_vm6, %v3267_v14 }
0x23bd   : > { %3300 = vst.msk [vmem:[%s4794_s30 + $0xe8] sm:$0xff] %vm3270_vm6, %v3259_v17 }
0x23be PF: > { %s27_s24 = sadd.s32 1, %s4114_s24  }
0x23bf   : > { %p24_p5 = scmp.ge.s32.totalorder %s27_s24, 4  }
0x23c1   :  { %26 = sbr.rel (!%p24_p5) target bundleno = 3 (0x3), region = 131 }

</bundles_post_ra>
